<compile_context>
chip_gen: v5e
topology: v5e:2x2
jax: 0.10.0
libtpu: 0.0.40
codegen_flags: <defaults>
</compile_context>

<pallas_src>
import functools

import jax
import jax.numpy as jnp
from jax.experimental import pallas as pl
from jax.experimental.pallas import tpu as pltpu


def _robustifier_kernel(x_ref, mask_ref, w_ref, p_ref, out_ref, *, img_w):
    """One batch-block step.

    x_ref   : (nb, C, H*W)  VMEM — normalized input, H*W on the lane axis
    mask_ref: (9, H*W)      VMEM — per-tap validity mask (SAME padding + roll wrap kill)
    w_ref   : (9*C*C,)      SMEM — conv weights, flat index (tap*C + c_out)*C + c_in
    p_ref   : (4*C,)        SMEM — [bias(C), eps(C), x_min(C), x_max(C)]
    out_ref : (nb, C, H*W)  VMEM
    """
    nb, C, HW = x_ref.shape
    W = img_w

    # Dense (nb, H*W) view of each input-channel plane: full 8-sublane / 128-lane vregs once
    # nb >= 8, regardless of C.  Reused by both the conv taps and the residual/clamp path.
    xs = [x_ref[:, c, :].astype(jnp.float32) for c in range(C)]

    # f32 accumulators, one per output channel.
    z = [jnp.zeros((nb, HW), jnp.float32) for _ in range(C)]

    # 3x3 SAME conv: 8 lane-rotations per input plane (centre tap needs none), masked for
    # padding / wrap, then a scalar-weighted VPU channel mix (SMEM scalar * vector FMAs).
    for kh in range(3):
        for kw in range(3):
            t = kh * 3 + kw
            off = (kh - 1) * W + (kw - 1)          # flat lane offset of this neighbour
            m = mask_ref[t:t + 1, :]               # (1, H*W) -> broadcasts over nb rows
            for c in range(C):
                if off == 0:
                    r = xs[c]                      # centre tap: always valid, no shift
                else:
                    # r[p] = xs[c][p + off] for valid positions; wrapped values are masked.
                    r = pltpu.roll(xs[c], (-off) % HW, axis=1) * m
                for o in range(C):
                    z[o] = z[o] + w_ref[(t * C + o) * C + c] * r

    # Epilogue: bias, dx = eps * tanh(z/2) (== eps * (-1 + 2*sigmoid(z))), clamp, store.
    for o in range(C):
        zo = z[o] + p_ref[0 * C + o]
        dx = p_ref[1 * C + o] * jnp.tanh(0.5 * zo)
        x_rob = jnp.clip(xs[o] + dx, p_ref[2 * C + o], p_ref[3 * C + o])
        out_ref[:, o, :] = x_rob.astype(out_ref.dtype)


def _pick_batch_block(n, c, hw, itemsize, target_bytes=512 * 1024):
    """Largest divisor of n with raw block <= target_bytes, keeping >= 2 grid steps (v7x)."""
    cap = max(1, target_bytes // max(1, c * hw * itemsize))
    if n >= 2:
        cap = min(cap, n // 2)          # keep both v7x TensorCores busy
    nb = 1
    for d in range(1, n + 1):
        if n % d == 0 and d <= cap:
            nb = d
    return nb


@jax.jit
def robustifier_forward(normalized_x, conv_w, conv_b, norm_eps, norm_xmin, norm_xmax):
    """normalized_x: (N, C, H, W) float32; conv_w: (C, C, 3, 3) OIHW; rest: (C,)."""
    N, C, H, W = normalized_x.shape
    HW = H * W
    dtype = normalized_x.dtype
    itemsize = jnp.dtype(dtype).itemsize

    nb = _pick_batch_block(N, C, HW, itemsize)
    grid = (N // nb,)

    # Free, contiguous reshape: H*W on the lane axis, no wrapper-side transposes or pads.
    x_flat = normalized_x.reshape(N, C, HW)

    # Conv weights flattened tap-major for SMEM scalar reads: ((kh*3+kw)*C + o)*C + i.
    w_flat = jnp.transpose(conv_w, (2, 3, 0, 1)).reshape(-1).astype(jnp.float32)
    # Per-channel params packed for SMEM: [bias, eps, x_min, x_max].
    params = jnp.concatenate([conv_b, norm_eps, norm_xmin, norm_xmax]).astype(jnp.float32)

    # Per-tap validity mask over the flattened H*W lane axis.  Zero where the 3x3 neighbour
    # falls outside the image (SAME zero padding) — which is exactly where pltpu.roll's
    # wrap-around would otherwise read the wrong row / the other vertical end of the image.
    pos = jnp.arange(HW, dtype=jnp.int32)
    hh, ww = pos // W, pos % W
    rows = []
    for kh in range(3):
        for kw in range(3):
            dh, dw = kh - 1, kw - 1
            ok = (hh + dh >= 0) & (hh + dh < H) & (ww + dw >= 0) & (ww + dw < W)
            rows.append(ok.astype(jnp.float32))
    mask = jnp.stack(rows, axis=0)                                    # (9, HW)

    out = pl.pallas_call(
        functools.partial(_robustifier_kernel, img_w=W),
        out_shape=jax.ShapeDtypeStruct((N, C, HW), dtype),
        grid_spec=pltpu.PrefetchScalarGridSpec(
            num_scalar_prefetch=0,
            grid=grid,
            in_specs=[
                pl.BlockSpec((nb, C, HW), lambda i: (i, 0, 0)),
                pl.BlockSpec((9, HW), lambda i: (0, 0)),      # constant block -> fetched once
                pl.BlockSpec(memory_space=pltpu.MemorySpace.SMEM),   # conv weights (scalars)
                pl.BlockSpec(memory_space=pltpu.MemorySpace.SMEM),   # bias/eps/min/max
            ],
            out_specs=pl.BlockSpec((nb, C, HW), lambda i: (i, 0, 0)),
        ),
        compiler_params=pltpu.CompilerParams(
            dimension_semantics=("parallel",),
            vmem_limit_bytes=32 * 1024 * 1024),
        cost_estimate=pl.CostEstimate(
            flops=2 * 9 * C * C * N * HW,
            transcendentals=N * C * HW,
            bytes_accessed=2 * N * C * HW * itemsize),
    )(x_flat, mask, w_flat, params)

    return out.reshape(N, C, H, W)


def _reference_forward(normalized_x, conv_w, conv_b, norm_eps, norm_xmin, norm_xmax):
    """Pure-JAX reference mirroring the PyTorch semantics."""
    z = jax.lax.conv_general_dilated(
        normalized_x, conv_w, window_strides=(1, 1), padding="SAME",
        dimension_numbers=("NCHW", "OIHW", "NCHW"),
        precision=jax.lax.Precision.HIGHEST)
    z = z + conv_b.reshape(1, -1, 1, 1)
    dx = norm_eps.reshape(1, -1, 1, 1) * (-1.0 + 2.0 * jax.nn.sigmoid(z))
    return jnp.clip(normalized_x + dx,
                    norm_xmin.reshape(1, -1, 1, 1),
                    norm_xmax.reshape(1, -1, 1, 1))


if __name__ == "__main__":
    N, C, H, W = 2, 4, 16, 16
    key = jax.random.PRNGKey(0)
    kx, kw, kb = jax.random.split(key, 3)

    # Raw image statistics (per channel), as the module's __init__ receives.
    x_min = jnp.zeros((C,), jnp.float32)
    x_max = jnp.ones((C,), jnp.float32)
    x_avg = jnp.full((C,), 0.5, jnp.float32)
    x_std = jnp.full((C,), 0.25, jnp.float32)
    x_epsilon_defense = jnp.full((C,), 8.0 / 255.0, jnp.float32)

    normalized_x_min = (x_min - x_avg) / x_std
    normalized_x_max = (x_max - x_avg) / x_std
    normalized_x_epsilon_defense = x_epsilon_defense / x_std

    # Deterministic convolutional_dnn parameters: Conv2d(C, C, 3, padding=1).
    conv_w = 0.1 * jax.random.normal(kw, (C, C, 3, 3), jnp.float32)   # (O, I, kh, kw)
    conv_b = 0.01 * jax.random.normal(kb, (C,), jnp.float32)

    normalized_x = jax.random.normal(kx, (N, C, H, W), jnp.float32)

    out = robustifier_forward(normalized_x, conv_w, conv_b,
                              normalized_x_epsilon_defense,
                              normalized_x_min, normalized_x_max)
    out = jax.block_until_ready(out)

    ref = _reference_forward(normalized_x, conv_w, conv_b,
                             normalized_x_epsilon_defense,
                             normalized_x_min, normalized_x_max)
    assert out.shape == (N, C, H, W)
    assert jnp.allclose(out, ref, atol=1e-4, rtol=1e-4)

    print("KERNEL_OK")
</pallas_src>

<mosaic_0001>
module attributes {stable_mosaic.version = 11 : i64} {
  func.func @_robustifier_kernel(%arg0: i32, %arg1: memref<1x4x256xf32, #tpu.memory_space<vmem>>, %arg2: memref<9x256xf32, #tpu.memory_space<vmem>>, %arg3: memref<144xf32, #tpu.memory_space<smem>>, %arg4: memref<16xf32, #tpu.memory_space<smem>>, %arg5: memref<1x4x256xf32, #tpu.memory_space<vmem>>) attributes {dimension_semantics = [#tpu.dimension_semantics<parallel>], iteration_bounds = array<i64: 2>, scalar_prefetch = 0 : i64, scratch_operands = 0 : i64, tpu.core_type = #tpu.core_type<tc>, window_params = [{transform_indices = @transform_0, window_bounds = array<i64: 1, 4, 256>}, {pipeline_mode = #tpu.pipeline_mode<synchronous>, transform_indices = @transform_1, window_bounds = array<i64: 9, 256>}, {transform_indices = @transform_2, window_bounds = array<i64: 144>}, {transform_indices = @transform_3, window_bounds = array<i64: 16>}, {transform_indices = @transform_4, window_bounds = array<i64: 1, 4, 256>}]} {
    %c0 = arith.constant 0 : index
    %c0_0 = arith.constant 0 : index
    %c0_1 = arith.constant 0 : index
    %0 = vector.load %arg1[%c0, %c0_0, %c0_1] : memref<1x4x256xf32, #tpu.memory_space<vmem>>, vector<1x1x256xf32>
    %1 = vector.shape_cast %0 : vector<1x1x256xf32> to vector<1x256xf32>
    %c0_2 = arith.constant 0 : index
    %c1 = arith.constant 1 : index
    %c0_3 = arith.constant 0 : index
    %2 = vector.load %arg1[%c0_2, %c1, %c0_3] : memref<1x4x256xf32, #tpu.memory_space<vmem>>, vector<1x1x256xf32>
    %3 = vector.shape_cast %2 : vector<1x1x256xf32> to vector<1x256xf32>
    %c0_4 = arith.constant 0 : index
    %c2 = arith.constant 2 : index
    %c0_5 = arith.constant 0 : index
    %4 = vector.load %arg1[%c0_4, %c2, %c0_5] : memref<1x4x256xf32, #tpu.memory_space<vmem>>, vector<1x1x256xf32>
    %5 = vector.shape_cast %4 : vector<1x1x256xf32> to vector<1x256xf32>
    %c0_6 = arith.constant 0 : index
    %c3 = arith.constant 3 : index
    %c0_7 = arith.constant 0 : index
    %6 = vector.load %arg1[%c0_6, %c3, %c0_7] : memref<1x4x256xf32, #tpu.memory_space<vmem>>, vector<1x1x256xf32>
    %7 = vector.shape_cast %6 : vector<1x1x256xf32> to vector<1x256xf32>
    %cst = arith.constant 0.000000e+00 : f32
    %8 = vector.broadcast %cst : f32 to vector<1x256xf32>
    %cst_8 = arith.constant 0.000000e+00 : f32
    %9 = vector.broadcast %cst_8 : f32 to vector<1x256xf32>
    %cst_9 = arith.constant 0.000000e+00 : f32
    %10 = vector.broadcast %cst_9 : f32 to vector<1x256xf32>
    %cst_10 = arith.constant 0.000000e+00 : f32
    %11 = vector.broadcast %cst_10 : f32 to vector<1x256xf32>
    %c0_11 = arith.constant 0 : index
    %c0_12 = arith.constant 0 : index
    %12 = vector.load %arg2[%c0_11, %c0_12] : memref<9x256xf32, #tpu.memory_space<vmem>>, vector<1x256xf32>
    %c17_i32 = arith.constant 17 : i32
    %13 = tpu.dynamic_rotate %1 by %c17_i32 dim 1 : vector<1x256xf32>, i32 -> vector<1x256xf32>
    %14 = arith.mulf %13, %12 : vector<1x256xf32>
    %c0_13 = arith.constant 0 : index
    %15 = memref.load %arg3[%c0_13] : memref<144xf32, #tpu.memory_space<smem>>
    %16 = vector.broadcast %15 : f32 to vector<1x256xf32>
    %17 = arith.mulf %16, %14 : vector<1x256xf32>
    %18 = arith.addf %8, %17 : vector<1x256xf32>
    %c4 = arith.constant 4 : index
    %19 = memref.load %arg3[%c4] : memref<144xf32, #tpu.memory_space<smem>>
    %20 = vector.broadcast %19 : f32 to vector<1x256xf32>
    %21 = arith.mulf %20, %14 : vector<1x256xf32>
    %22 = arith.addf %9, %21 : vector<1x256xf32>
    %c8 = arith.constant 8 : index
    %23 = memref.load %arg3[%c8] : memref<144xf32, #tpu.memory_space<smem>>
    %24 = vector.broadcast %23 : f32 to vector<1x256xf32>
    %25 = arith.mulf %24, %14 : vector<1x256xf32>
    %26 = arith.addf %10, %25 : vector<1x256xf32>
    %c12 = arith.constant 12 : index
    %27 = memref.load %arg3[%c12] : memref<144xf32, #tpu.memory_space<smem>>
    %28 = vector.broadcast %27 : f32 to vector<1x256xf32>
    %29 = arith.mulf %28, %14 : vector<1x256xf32>
    %30 = arith.addf %11, %29 : vector<1x256xf32>
    %c17_i32_14 = arith.constant 17 : i32
    %31 = tpu.dynamic_rotate %3 by %c17_i32_14 dim 1 : vector<1x256xf32>, i32 -> vector<1x256xf32>
    %32 = arith.mulf %31, %12 : vector<1x256xf32>
    %c1_15 = arith.constant 1 : index
    %33 = memref.load %arg3[%c1_15] : memref<144xf32, #tpu.memory_space<smem>>
    %34 = vector.broadcast %33 : f32 to vector<1x256xf32>
    %35 = arith.mulf %34, %32 : vector<1x256xf32>
    %36 = arith.addf %18, %35 : vector<1x256xf32>
    %c5 = arith.constant 5 : index
    %37 = memref.load %arg3[%c5] : memref<144xf32, #tpu.memory_space<smem>>
    %38 = vector.broadcast %37 : f32 to vector<1x256xf32>
    %39 = arith.mulf %38, %32 : vector<1x256xf32>
    %40 = arith.addf %22, %39 : vector<1x256xf32>
    %c9 = arith.constant 9 : index
    %41 = memref.load %arg3[%c9] : memref<144xf32, #tpu.memory_space<smem>>
    %42 = vector.broadcast %41 : f32 to vector<1x256xf32>
    %43 = arith.mulf %42, %32 : vector<1x256xf32>
    %44 = arith.addf %26, %43 : vector<1x256xf32>
    %c13 = arith.constant 13 : index
    %45 = memref.load %arg3[%c13] : memref<144xf32, #tpu.memory_space<smem>>
    %46 = vector.broadcast %45 : f32 to vector<1x256xf32>
    %47 = arith.mulf %46, %32 : vector<1x256xf32>
    %48 = arith.addf %30, %47 : vector<1x256xf32>
    %c17_i32_16 = arith.constant 17 : i32
    %49 = tpu.dynamic_rotate %5 by %c17_i32_16 dim 1 : vector<1x256xf32>, i32 -> vector<1x256xf32>
    %50 = arith.mulf %49, %12 : vector<1x256xf32>
    %c2_17 = arith.constant 2 : index
    %51 = memref.load %arg3[%c2_17] : memref<144xf32, #tpu.memory_space<smem>>
    %52 = vector.broadcast %51 : f32 to vector<1x256xf32>
    %53 = arith.mulf %52, %50 : vector<1x256xf32>
    %54 = arith.addf %36, %53 : vector<1x256xf32>
    %c6 = arith.constant 6 : index
    %55 = memref.load %arg3[%c6] : memref<144xf32, #tpu.memory_space<smem>>
    %56 = vector.broadcast %55 : f32 to vector<1x256xf32>
    %57 = arith.mulf %56, %50 : vector<1x256xf32>
    %58 = arith.addf %40, %57 : vector<1x256xf32>
    %c10 = arith.constant 10 : index
    %59 = memref.load %arg3[%c10] : memref<144xf32, #tpu.memory_space<smem>>
    %60 = vector.broadcast %59 : f32 to vector<1x256xf32>
    %61 = arith.mulf %60, %50 : vector<1x256xf32>
    %62 = arith.addf %44, %61 : vector<1x256xf32>
    %c14 = arith.constant 14 : index
    %63 = memref.load %arg3[%c14] : memref<144xf32, #tpu.memory_space<smem>>
    %64 = vector.broadcast %63 : f32 to vector<1x256xf32>
    %65 = arith.mulf %64, %50 : vector<1x256xf32>
    %66 = arith.addf %48, %65 : vector<1x256xf32>
    %c17_i32_18 = arith.constant 17 : i32
    %67 = tpu.dynamic_rotate %7 by %c17_i32_18 dim 1 : vector<1x256xf32>, i32 -> vector<1x256xf32>
    %68 = arith.mulf %67, %12 : vector<1x256xf32>
    %c3_19 = arith.constant 3 : index
    %69 = memref.load %arg3[%c3_19] : memref<144xf32, #tpu.memory_space<smem>>
    %70 = vector.broadcast %69 : f32 to vector<1x256xf32>
    %71 = arith.mulf %70, %68 : vector<1x256xf32>
    %72 = arith.addf %54, %71 : vector<1x256xf32>
    %c7 = arith.constant 7 : index
    %73 = memref.load %arg3[%c7] : memref<144xf32, #tpu.memory_space<smem>>
    %74 = vector.broadcast %73 : f32 to vector<1x256xf32>
    %75 = arith.mulf %74, %68 : vector<1x256xf32>
    %76 = arith.addf %58, %75 : vector<1x256xf32>
    %c11 = arith.constant 11 : index
    %77 = memref.load %arg3[%c11] : memref<144xf32, #tpu.memory_space<smem>>
    %78 = vector.broadcast %77 : f32 to vector<1x256xf32>
    %79 = arith.mulf %78, %68 : vector<1x256xf32>
    %80 = arith.addf %62, %79 : vector<1x256xf32>
    %c15 = arith.constant 15 : index
    %81 = memref.load %arg3[%c15] : memref<144xf32, #tpu.memory_space<smem>>
    %82 = vector.broadcast %81 : f32 to vector<1x256xf32>
    %83 = arith.mulf %82, %68 : vector<1x256xf32>
    %84 = arith.addf %66, %83 : vector<1x256xf32>
    %c1_20 = arith.constant 1 : index
    %c0_21 = arith.constant 0 : index
    %85 = vector.load %arg2[%c1_20, %c0_21] : memref<9x256xf32, #tpu.memory_space<vmem>>, vector<1x256xf32>
    %c16_i32 = arith.constant 16 : i32
    %86 = tpu.dynamic_rotate %1 by %c16_i32 dim 1 : vector<1x256xf32>, i32 -> vector<1x256xf32>
    %87 = arith.mulf %86, %85 : vector<1x256xf32>
    %c16 = arith.constant 16 : index
    %88 = memref.load %arg3[%c16] : memref<144xf32, #tpu.memory_space<smem>>
    %89 = vector.broadcast %88 : f32 to vector<1x256xf32>
    %90 = arith.mulf %89, %87 : vector<1x256xf32>
    %91 = arith.addf %72, %90 : vector<1x256xf32>
    %c20 = arith.constant 20 : index
    %92 = memref.load %arg3[%c20] : memref<144xf32, #tpu.memory_space<smem>>
    %93 = vector.broadcast %92 : f32 to vector<1x256xf32>
    %94 = arith.mulf %93, %87 : vector<1x256xf32>
    %95 = arith.addf %76, %94 : vector<1x256xf32>
    %c24 = arith.constant 24 : index
    %96 = memref.load %arg3[%c24] : memref<144xf32, #tpu.memory_space<smem>>
    %97 = vector.broadcast %96 : f32 to vector<1x256xf32>
    %98 = arith.mulf %97, %87 : vector<1x256xf32>
    %99 = arith.addf %80, %98 : vector<1x256xf32>
    %c28 = arith.constant 28 : index
    %100 = memref.load %arg3[%c28] : memref<144xf32, #tpu.memory_space<smem>>
    %101 = vector.broadcast %100 : f32 to vector<1x256xf32>
    %102 = arith.mulf %101, %87 : vector<1x256xf32>
    %103 = arith.addf %84, %102 : vector<1x256xf32>
    %c16_i32_22 = arith.constant 16 : i32
    %104 = tpu.dynamic_rotate %3 by %c16_i32_22 dim 1 : vector<1x256xf32>, i32 -> vector<1x256xf32>
    %105 = arith.mulf %104, %85 : vector<1x256xf32>
    %c17 = arith.constant 17 : index
    %106 = memref.load %arg3[%c17] : memref<144xf32, #tpu.memory_space<smem>>
    %107 = vector.broadcast %106 : f32 to vector<1x256xf32>
    %108 = arith.mulf %107, %105 : vector<1x256xf32>
    %109 = arith.addf %91, %108 : vector<1x256xf32>
    %c21 = arith.constant 21 : index
    %110 = memref.load %arg3[%c21] : memref<144xf32, #tpu.memory_space<smem>>
    %111 = vector.broadcast %110 : f32 to vector<1x256xf32>
    %112 = arith.mulf %111, %105 : vector<1x256xf32>
    %113 = arith.addf %95, %112 : vector<1x256xf32>
    %c25 = arith.constant 25 : index
    %114 = memref.load %arg3[%c25] : memref<144xf32, #tpu.memory_space<smem>>
    %115 = vector.broadcast %114 : f32 to vector<1x256xf32>
    %116 = arith.mulf %115, %105 : vector<1x256xf32>
    %117 = arith.addf %99, %116 : vector<1x256xf32>
    %c29 = arith.constant 29 : index
    %118 = memref.load %arg3[%c29] : memref<144xf32, #tpu.memory_space<smem>>
    %119 = vector.broadcast %118 : f32 to vector<1x256xf32>
    %120 = arith.mulf %119, %105 : vector<1x256xf32>
    %121 = arith.addf %103, %120 : vector<1x256xf32>
    %c16_i32_23 = arith.constant 16 : i32
    %122 = tpu.dynamic_rotate %5 by %c16_i32_23 dim 1 : vector<1x256xf32>, i32 -> vector<1x256xf32>
    %123 = arith.mulf %122, %85 : vector<1x256xf32>
    %c18 = arith.constant 18 : index
    %124 = memref.load %arg3[%c18] : memref<144xf32, #tpu.memory_space<smem>>
    %125 = vector.broadcast %124 : f32 to vector<1x256xf32>
    %126 = arith.mulf %125, %123 : vector<1x256xf32>
    %127 = arith.addf %109, %126 : vector<1x256xf32>
    %c22 = arith.constant 22 : index
    %128 = memref.load %arg3[%c22] : memref<144xf32, #tpu.memory_space<smem>>
    %129 = vector.broadcast %128 : f32 to vector<1x256xf32>
    %130 = arith.mulf %129, %123 : vector<1x256xf32>
    %131 = arith.addf %113, %130 : vector<1x256xf32>
    %c26 = arith.constant 26 : index
    %132 = memref.load %arg3[%c26] : memref<144xf32, #tpu.memory_space<smem>>
    %133 = vector.broadcast %132 : f32 to vector<1x256xf32>
    %134 = arith.mulf %133, %123 : vector<1x256xf32>
    %135 = arith.addf %117, %134 : vector<1x256xf32>
    %c30 = arith.constant 30 : index
    %136 = memref.load %arg3[%c30] : memref<144xf32, #tpu.memory_space<smem>>
    %137 = vector.broadcast %136 : f32 to vector<1x256xf32>
    %138 = arith.mulf %137, %123 : vector<1x256xf32>
    %139 = arith.addf %121, %138 : vector<1x256xf32>
    %c16_i32_24 = arith.constant 16 : i32
    %140 = tpu.dynamic_rotate %7 by %c16_i32_24 dim 1 : vector<1x256xf32>, i32 -> vector<1x256xf32>
    %141 = arith.mulf %140, %85 : vector<1x256xf32>
    %c19 = arith.constant 19 : index
    %142 = memref.load %arg3[%c19] : memref<144xf32, #tpu.memory_space<smem>>
    %143 = vector.broadcast %142 : f32 to vector<1x256xf32>
    %144 = arith.mulf %143, %141 : vector<1x256xf32>
    %145 = arith.addf %127, %144 : vector<1x256xf32>
    %c23 = arith.constant 23 : index
    %146 = memref.load %arg3[%c23] : memref<144xf32, #tpu.memory_space<smem>>
    %147 = vector.broadcast %146 : f32 to vector<1x256xf32>
    %148 = arith.mulf %147, %141 : vector<1x256xf32>
    %149 = arith.addf %131, %148 : vector<1x256xf32>
    %c27 = arith.constant 27 : index
    %150 = memref.load %arg3[%c27] : memref<144xf32, #tpu.memory_space<smem>>
    %151 = vector.broadcast %150 : f32 to vector<1x256xf32>
    %152 = arith.mulf %151, %141 : vector<1x256xf32>
    %153 = arith.addf %135, %152 : vector<1x256xf32>
    %c31 = arith.constant 31 : index
    %154 = memref.load %arg3[%c31] : memref<144xf32, #tpu.memory_space<smem>>
    %155 = vector.broadcast %154 : f32 to vector<1x256xf32>
    %156 = arith.mulf %155, %141 : vector<1x256xf32>
    %157 = arith.addf %139, %156 : vector<1x256xf32>
    %c2_25 = arith.constant 2 : index
    %c0_26 = arith.constant 0 : index
    %158 = vector.load %arg2[%c2_25, %c0_26] : memref<9x256xf32, #tpu.memory_space<vmem>>, vector<1x256xf32>
    %c15_i32 = arith.constant 15 : i32
    %159 = tpu.dynamic_rotate %1 by %c15_i32 dim 1 : vector<1x256xf32>, i32 -> vector<1x256xf32>
    %160 = arith.mulf %159, %158 : vector<1x256xf32>
    %c32 = arith.constant 32 : index
    %161 = memref.load %arg3[%c32] : memref<144xf32, #tpu.memory_space<smem>>
    %162 = vector.broadcast %161 : f32 to vector<1x256xf32>
    %163 = arith.mulf %162, %160 : vector<1x256xf32>
    %164 = arith.addf %145, %163 : vector<1x256xf32>
    %c36 = arith.constant 36 : index
    %165 = memref.load %arg3[%c36] : memref<144xf32, #tpu.memory_space<smem>>
    %166 = vector.broadcast %165 : f32 to vector<1x256xf32>
    %167 = arith.mulf %166, %160 : vector<1x256xf32>
    %168 = arith.addf %149, %167 : vector<1x256xf32>
    %c40 = arith.constant 40 : index
    %169 = memref.load %arg3[%c40] : memref<144xf32, #tpu.memory_space<smem>>
    %170 = vector.broadcast %169 : f32 to vector<1x256xf32>
    %171 = arith.mulf %170, %160 : vector<1x256xf32>
    %172 = arith.addf %153, %171 : vector<1x256xf32>
    %c44 = arith.constant 44 : index
    %173 = memref.load %arg3[%c44] : memref<144xf32, #tpu.memory_space<smem>>
    %174 = vector.broadcast %173 : f32 to vector<1x256xf32>
    %175 = arith.mulf %174, %160 : vector<1x256xf32>
    %176 = arith.addf %157, %175 : vector<1x256xf32>
    %c15_i32_27 = arith.constant 15 : i32
    %177 = tpu.dynamic_rotate %3 by %c15_i32_27 dim 1 : vector<1x256xf32>, i32 -> vector<1x256xf32>
    %178 = arith.mulf %177, %158 : vector<1x256xf32>
    %c33 = arith.constant 33 : index
    %179 = memref.load %arg3[%c33] : memref<144xf32, #tpu.memory_space<smem>>
    %180 = vector.broadcast %179 : f32 to vector<1x256xf32>
    %181 = arith.mulf %180, %178 : vector<1x256xf32>
    %182 = arith.addf %164, %181 : vector<1x256xf32>
    %c37 = arith.constant 37 : index
    %183 = memref.load %arg3[%c37] : memref<144xf32, #tpu.memory_space<smem>>
    %184 = vector.broadcast %183 : f32 to vector<1x256xf32>
    %185 = arith.mulf %184, %178 : vector<1x256xf32>
    %186 = arith.addf %168, %185 : vector<1x256xf32>
    %c41 = arith.constant 41 : index
    %187 = memref.load %arg3[%c41] : memref<144xf32, #tpu.memory_space<smem>>
    %188 = vector.broadcast %187 : f32 to vector<1x256xf32>
    %189 = arith.mulf %188, %178 : vector<1x256xf32>
    %190 = arith.addf %172, %189 : vector<1x256xf32>
    %c45 = arith.constant 45 : index
    %191 = memref.load %arg3[%c45] : memref<144xf32, #tpu.memory_space<smem>>
    %192 = vector.broadcast %191 : f32 to vector<1x256xf32>
    %193 = arith.mulf %192, %178 : vector<1x256xf32>
    %194 = arith.addf %176, %193 : vector<1x256xf32>
    %c15_i32_28 = arith.constant 15 : i32
    %195 = tpu.dynamic_rotate %5 by %c15_i32_28 dim 1 : vector<1x256xf32>, i32 -> vector<1x256xf32>
    %196 = arith.mulf %195, %158 : vector<1x256xf32>
    %c34 = arith.constant 34 : index
    %197 = memref.load %arg3[%c34] : memref<144xf32, #tpu.memory_space<smem>>
    %198 = vector.broadcast %197 : f32 to vector<1x256xf32>
    %199 = arith.mulf %198, %196 : vector<1x256xf32>
    %200 = arith.addf %182, %199 : vector<1x256xf32>
    %c38 = arith.constant 38 : index
    %201 = memref.load %arg3[%c38] : memref<144xf32, #tpu.memory_space<smem>>
    %202 = vector.broadcast %201 : f32 to vector<1x256xf32>
    %203 = arith.mulf %202, %196 : vector<1x256xf32>
    %204 = arith.addf %186, %203 : vector<1x256xf32>
    %c42 = arith.constant 42 : index
    %205 = memref.load %arg3[%c42] : memref<144xf32, #tpu.memory_space<smem>>
    %206 = vector.broadcast %205 : f32 to vector<1x256xf32>
    %207 = arith.mulf %206, %196 : vector<1x256xf32>
    %208 = arith.addf %190, %207 : vector<1x256xf32>
    %c46 = arith.constant 46 : index
    %209 = memref.load %arg3[%c46] : memref<144xf32, #tpu.memory_space<smem>>
    %210 = vector.broadcast %209 : f32 to vector<1x256xf32>
    %211 = arith.mulf %210, %196 : vector<1x256xf32>
    %212 = arith.addf %194, %211 : vector<1x256xf32>
    %c15_i32_29 = arith.constant 15 : i32
    %213 = tpu.dynamic_rotate %7 by %c15_i32_29 dim 1 : vector<1x256xf32>, i32 -> vector<1x256xf32>
    %214 = arith.mulf %213, %158 : vector<1x256xf32>
    %c35 = arith.constant 35 : index
    %215 = memref.load %arg3[%c35] : memref<144xf32, #tpu.memory_space<smem>>
    %216 = vector.broadcast %215 : f32 to vector<1x256xf32>
    %217 = arith.mulf %216, %214 : vector<1x256xf32>
    %218 = arith.addf %200, %217 : vector<1x256xf32>
    %c39 = arith.constant 39 : index
    %219 = memref.load %arg3[%c39] : memref<144xf32, #tpu.memory_space<smem>>
    %220 = vector.broadcast %219 : f32 to vector<1x256xf32>
    %221 = arith.mulf %220, %214 : vector<1x256xf32>
    %222 = arith.addf %204, %221 : vector<1x256xf32>
    %c43 = arith.constant 43 : index
    %223 = memref.load %arg3[%c43] : memref<144xf32, #tpu.memory_space<smem>>
    %224 = vector.broadcast %223 : f32 to vector<1x256xf32>
    %225 = arith.mulf %224, %214 : vector<1x256xf32>
    %226 = arith.addf %208, %225 : vector<1x256xf32>
    %c47 = arith.constant 47 : index
    %227 = memref.load %arg3[%c47] : memref<144xf32, #tpu.memory_space<smem>>
    %228 = vector.broadcast %227 : f32 to vector<1x256xf32>
    %229 = arith.mulf %228, %214 : vector<1x256xf32>
    %230 = arith.addf %212, %229 : vector<1x256xf32>
    %c3_30 = arith.constant 3 : index
    %c0_31 = arith.constant 0 : index
    %231 = vector.load %arg2[%c3_30, %c0_31] : memref<9x256xf32, #tpu.memory_space<vmem>>, vector<1x256xf32>
    %c1_i32 = arith.constant 1 : i32
    %232 = tpu.dynamic_rotate %1 by %c1_i32 dim 1 : vector<1x256xf32>, i32 -> vector<1x256xf32>
    %233 = arith.mulf %232, %231 : vector<1x256xf32>
    %c48 = arith.constant 48 : index
    %234 = memref.load %arg3[%c48] : memref<144xf32, #tpu.memory_space<smem>>
    %235 = vector.broadcast %234 : f32 to vector<1x256xf32>
    %236 = arith.mulf %235, %233 : vector<1x256xf32>
    %237 = arith.addf %218, %236 : vector<1x256xf32>
    %c52 = arith.constant 52 : index
    %238 = memref.load %arg3[%c52] : memref<144xf32, #tpu.memory_space<smem>>
    %239 = vector.broadcast %238 : f32 to vector<1x256xf32>
    %240 = arith.mulf %239, %233 : vector<1x256xf32>
    %241 = arith.addf %222, %240 : vector<1x256xf32>
    %c56 = arith.constant 56 : index
    %242 = memref.load %arg3[%c56] : memref<144xf32, #tpu.memory_space<smem>>
    %243 = vector.broadcast %242 : f32 to vector<1x256xf32>
    %244 = arith.mulf %243, %233 : vector<1x256xf32>
    %245 = arith.addf %226, %244 : vector<1x256xf32>
    %c60 = arith.constant 60 : index
    %246 = memref.load %arg3[%c60] : memref<144xf32, #tpu.memory_space<smem>>
    %247 = vector.broadcast %246 : f32 to vector<1x256xf32>
    %248 = arith.mulf %247, %233 : vector<1x256xf32>
    %249 = arith.addf %230, %248 : vector<1x256xf32>
    %c1_i32_32 = arith.constant 1 : i32
    %250 = tpu.dynamic_rotate %3 by %c1_i32_32 dim 1 : vector<1x256xf32>, i32 -> vector<1x256xf32>
    %251 = arith.mulf %250, %231 : vector<1x256xf32>
    %c49 = arith.constant 49 : index
    %252 = memref.load %arg3[%c49] : memref<144xf32, #tpu.memory_space<smem>>
    %253 = vector.broadcast %252 : f32 to vector<1x256xf32>
    %254 = arith.mulf %253, %251 : vector<1x256xf32>
    %255 = arith.addf %237, %254 : vector<1x256xf32>
    %c53 = arith.constant 53 : index
    %256 = memref.load %arg3[%c53] : memref<144xf32, #tpu.memory_space<smem>>
    %257 = vector.broadcast %256 : f32 to vector<1x256xf32>
    %258 = arith.mulf %257, %251 : vector<1x256xf32>
    %259 = arith.addf %241, %258 : vector<1x256xf32>
    %c57 = arith.constant 57 : index
    %260 = memref.load %arg3[%c57] : memref<144xf32, #tpu.memory_space<smem>>
    %261 = vector.broadcast %260 : f32 to vector<1x256xf32>
    %262 = arith.mulf %261, %251 : vector<1x256xf32>
    %263 = arith.addf %245, %262 : vector<1x256xf32>
    %c61 = arith.constant 61 : index
    %264 = memref.load %arg3[%c61] : memref<144xf32, #tpu.memory_space<smem>>
    %265 = vector.broadcast %264 : f32 to vector<1x256xf32>
    %266 = arith.mulf %265, %251 : vector<1x256xf32>
    %267 = arith.addf %249, %266 : vector<1x256xf32>
    %c1_i32_33 = arith.constant 1 : i32
    %268 = tpu.dynamic_rotate %5 by %c1_i32_33 dim 1 : vector<1x256xf32>, i32 -> vector<1x256xf32>
    %269 = arith.mulf %268, %231 : vector<1x256xf32>
    %c50 = arith.constant 50 : index
    %270 = memref.load %arg3[%c50] : memref<144xf32, #tpu.memory_space<smem>>
    %271 = vector.broadcast %270 : f32 to vector<1x256xf32>
    %272 = arith.mulf %271, %269 : vector<1x256xf32>
    %273 = arith.addf %255, %272 : vector<1x256xf32>
    %c54 = arith.constant 54 : index
    %274 = memref.load %arg3[%c54] : memref<144xf32, #tpu.memory_space<smem>>
    %275 = vector.broadcast %274 : f32 to vector<1x256xf32>
    %276 = arith.mulf %275, %269 : vector<1x256xf32>
    %277 = arith.addf %259, %276 : vector<1x256xf32>
    %c58 = arith.constant 58 : index
    %278 = memref.load %arg3[%c58] : memref<144xf32, #tpu.memory_space<smem>>
    %279 = vector.broadcast %278 : f32 to vector<1x256xf32>
    %280 = arith.mulf %279, %269 : vector<1x256xf32>
    %281 = arith.addf %263, %280 : vector<1x256xf32>
    %c62 = arith.constant 62 : index
    %282 = memref.load %arg3[%c62] : memref<144xf32, #tpu.memory_space<smem>>
    %283 = vector.broadcast %282 : f32 to vector<1x256xf32>
    %284 = arith.mulf %283, %269 : vector<1x256xf32>
    %285 = arith.addf %267, %284 : vector<1x256xf32>
    %c1_i32_34 = arith.constant 1 : i32
    %286 = tpu.dynamic_rotate %7 by %c1_i32_34 dim 1 : vector<1x256xf32>, i32 -> vector<1x256xf32>
    %287 = arith.mulf %286, %231 : vector<1x256xf32>
    %c51 = arith.constant 51 : index
    %288 = memref.load %arg3[%c51] : memref<144xf32, #tpu.memory_space<smem>>
    %289 = vector.broadcast %288 : f32 to vector<1x256xf32>
    %290 = arith.mulf %289, %287 : vector<1x256xf32>
    %291 = arith.addf %273, %290 : vector<1x256xf32>
    %c55 = arith.constant 55 : index
    %292 = memref.load %arg3[%c55] : memref<144xf32, #tpu.memory_space<smem>>
    %293 = vector.broadcast %292 : f32 to vector<1x256xf32>
    %294 = arith.mulf %293, %287 : vector<1x256xf32>
    %295 = arith.addf %277, %294 : vector<1x256xf32>
    %c59 = arith.constant 59 : index
    %296 = memref.load %arg3[%c59] : memref<144xf32, #tpu.memory_space<smem>>
    %297 = vector.broadcast %296 : f32 to vector<1x256xf32>
    %298 = arith.mulf %297, %287 : vector<1x256xf32>
    %299 = arith.addf %281, %298 : vector<1x256xf32>
    %c63 = arith.constant 63 : index
    %300 = memref.load %arg3[%c63] : memref<144xf32, #tpu.memory_space<smem>>
    %301 = vector.broadcast %300 : f32 to vector<1x256xf32>
    %302 = arith.mulf %301, %287 : vector<1x256xf32>
    %303 = arith.addf %285, %302 : vector<1x256xf32>
    %c64 = arith.constant 64 : index
    %304 = memref.load %arg3[%c64] : memref<144xf32, #tpu.memory_space<smem>>
    %305 = vector.broadcast %304 : f32 to vector<1x256xf32>
    %306 = arith.mulf %305, %1 : vector<1x256xf32>
    %307 = arith.addf %291, %306 : vector<1x256xf32>
    %c68 = arith.constant 68 : index
    %308 = memref.load %arg3[%c68] : memref<144xf32, #tpu.memory_space<smem>>
    %309 = vector.broadcast %308 : f32 to vector<1x256xf32>
    %310 = arith.mulf %309, %1 : vector<1x256xf32>
    %311 = arith.addf %295, %310 : vector<1x256xf32>
    %c72 = arith.constant 72 : index
    %312 = memref.load %arg3[%c72] : memref<144xf32, #tpu.memory_space<smem>>
    %313 = vector.broadcast %312 : f32 to vector<1x256xf32>
    %314 = arith.mulf %313, %1 : vector<1x256xf32>
    %315 = arith.addf %299, %314 : vector<1x256xf32>
    %c76 = arith.constant 76 : index
    %316 = memref.load %arg3[%c76] : memref<144xf32, #tpu.memory_space<smem>>
    %317 = vector.broadcast %316 : f32 to vector<1x256xf32>
    %318 = arith.mulf %317, %1 : vector<1x256xf32>
    %319 = arith.addf %303, %318 : vector<1x256xf32>
    %c65 = arith.constant 65 : index
    %320 = memref.load %arg3[%c65] : memref<144xf32, #tpu.memory_space<smem>>
    %321 = vector.broadcast %320 : f32 to vector<1x256xf32>
    %322 = arith.mulf %321, %3 : vector<1x256xf32>
    %323 = arith.addf %307, %322 : vector<1x256xf32>
    %c69 = arith.constant 69 : index
    %324 = memref.load %arg3[%c69] : memref<144xf32, #tpu.memory_space<smem>>
    %325 = vector.broadcast %324 : f32 to vector<1x256xf32>
    %326 = arith.mulf %325, %3 : vector<1x256xf32>
    %327 = arith.addf %311, %326 : vector<1x256xf32>
    %c73 = arith.constant 73 : index
    %328 = memref.load %arg3[%c73] : memref<144xf32, #tpu.memory_space<smem>>
    %329 = vector.broadcast %328 : f32 to vector<1x256xf32>
    %330 = arith.mulf %329, %3 : vector<1x256xf32>
    %331 = arith.addf %315, %330 : vector<1x256xf32>
    %c77 = arith.constant 77 : index
    %332 = memref.load %arg3[%c77] : memref<144xf32, #tpu.memory_space<smem>>
    %333 = vector.broadcast %332 : f32 to vector<1x256xf32>
    %334 = arith.mulf %333, %3 : vector<1x256xf32>
    %335 = arith.addf %319, %334 : vector<1x256xf32>
    %c66 = arith.constant 66 : index
    %336 = memref.load %arg3[%c66] : memref<144xf32, #tpu.memory_space<smem>>
    %337 = vector.broadcast %336 : f32 to vector<1x256xf32>
    %338 = arith.mulf %337, %5 : vector<1x256xf32>
    %339 = arith.addf %323, %338 : vector<1x256xf32>
    %c70 = arith.constant 70 : index
    %340 = memref.load %arg3[%c70] : memref<144xf32, #tpu.memory_space<smem>>
    %341 = vector.broadcast %340 : f32 to vector<1x256xf32>
    %342 = arith.mulf %341, %5 : vector<1x256xf32>
    %343 = arith.addf %327, %342 : vector<1x256xf32>
    %c74 = arith.constant 74 : index
    %344 = memref.load %arg3[%c74] : memref<144xf32, #tpu.memory_space<smem>>
    %345 = vector.broadcast %344 : f32 to vector<1x256xf32>
    %346 = arith.mulf %345, %5 : vector<1x256xf32>
    %347 = arith.addf %331, %346 : vector<1x256xf32>
    %c78 = arith.constant 78 : index
    %348 = memref.load %arg3[%c78] : memref<144xf32, #tpu.memory_space<smem>>
    %349 = vector.broadcast %348 : f32 to vector<1x256xf32>
    %350 = arith.mulf %349, %5 : vector<1x256xf32>
    %351 = arith.addf %335, %350 : vector<1x256xf32>
    %c67 = arith.constant 67 : index
    %352 = memref.load %arg3[%c67] : memref<144xf32, #tpu.memory_space<smem>>
    %353 = vector.broadcast %352 : f32 to vector<1x256xf32>
    %354 = arith.mulf %353, %7 : vector<1x256xf32>
    %355 = arith.addf %339, %354 : vector<1x256xf32>
    %c71 = arith.constant 71 : index
    %356 = memref.load %arg3[%c71] : memref<144xf32, #tpu.memory_space<smem>>
    %357 = vector.broadcast %356 : f32 to vector<1x256xf32>
    %358 = arith.mulf %357, %7 : vector<1x256xf32>
    %359 = arith.addf %343, %358 : vector<1x256xf32>
    %c75 = arith.constant 75 : index
    %360 = memref.load %arg3[%c75] : memref<144xf32, #tpu.memory_space<smem>>
    %361 = vector.broadcast %360 : f32 to vector<1x256xf32>
    %362 = arith.mulf %361, %7 : vector<1x256xf32>
    %363 = arith.addf %347, %362 : vector<1x256xf32>
    %c79 = arith.constant 79 : index
    %364 = memref.load %arg3[%c79] : memref<144xf32, #tpu.memory_space<smem>>
    %365 = vector.broadcast %364 : f32 to vector<1x256xf32>
    %366 = arith.mulf %365, %7 : vector<1x256xf32>
    %367 = arith.addf %351, %366 : vector<1x256xf32>
    %c5_35 = arith.constant 5 : index
    %c0_36 = arith.constant 0 : index
    %368 = vector.load %arg2[%c5_35, %c0_36] : memref<9x256xf32, #tpu.memory_space<vmem>>, vector<1x256xf32>
    %c255_i32 = arith.constant 255 : i32
    %369 = tpu.dynamic_rotate %1 by %c255_i32 dim 1 : vector<1x256xf32>, i32 -> vector<1x256xf32>
    %370 = arith.mulf %369, %368 : vector<1x256xf32>
    %c80 = arith.constant 80 : index
    %371 = memref.load %arg3[%c80] : memref<144xf32, #tpu.memory_space<smem>>
    %372 = vector.broadcast %371 : f32 to vector<1x256xf32>
    %373 = arith.mulf %372, %370 : vector<1x256xf32>
    %374 = arith.addf %355, %373 : vector<1x256xf32>
    %c84 = arith.constant 84 : index
    %375 = memref.load %arg3[%c84] : memref<144xf32, #tpu.memory_space<smem>>
    %376 = vector.broadcast %375 : f32 to vector<1x256xf32>
    %377 = arith.mulf %376, %370 : vector<1x256xf32>
    %378 = arith.addf %359, %377 : vector<1x256xf32>
    %c88 = arith.constant 88 : index
    %379 = memref.load %arg3[%c88] : memref<144xf32, #tpu.memory_space<smem>>
    %380 = vector.broadcast %379 : f32 to vector<1x256xf32>
    %381 = arith.mulf %380, %370 : vector<1x256xf32>
    %382 = arith.addf %363, %381 : vector<1x256xf32>
    %c92 = arith.constant 92 : index
    %383 = memref.load %arg3[%c92] : memref<144xf32, #tpu.memory_space<smem>>
    %384 = vector.broadcast %383 : f32 to vector<1x256xf32>
    %385 = arith.mulf %384, %370 : vector<1x256xf32>
    %386 = arith.addf %367, %385 : vector<1x256xf32>
    %c255_i32_37 = arith.constant 255 : i32
    %387 = tpu.dynamic_rotate %3 by %c255_i32_37 dim 1 : vector<1x256xf32>, i32 -> vector<1x256xf32>
    %388 = arith.mulf %387, %368 : vector<1x256xf32>
    %c81 = arith.constant 81 : index
    %389 = memref.load %arg3[%c81] : memref<144xf32, #tpu.memory_space<smem>>
    %390 = vector.broadcast %389 : f32 to vector<1x256xf32>
    %391 = arith.mulf %390, %388 : vector<1x256xf32>
    %392 = arith.addf %374, %391 : vector<1x256xf32>
    %c85 = arith.constant 85 : index
    %393 = memref.load %arg3[%c85] : memref<144xf32, #tpu.memory_space<smem>>
    %394 = vector.broadcast %393 : f32 to vector<1x256xf32>
    %395 = arith.mulf %394, %388 : vector<1x256xf32>
    %396 = arith.addf %378, %395 : vector<1x256xf32>
    %c89 = arith.constant 89 : index
    %397 = memref.load %arg3[%c89] : memref<144xf32, #tpu.memory_space<smem>>
    %398 = vector.broadcast %397 : f32 to vector<1x256xf32>
    %399 = arith.mulf %398, %388 : vector<1x256xf32>
    %400 = arith.addf %382, %399 : vector<1x256xf32>
    %c93 = arith.constant 93 : index
    %401 = memref.load %arg3[%c93] : memref<144xf32, #tpu.memory_space<smem>>
    %402 = vector.broadcast %401 : f32 to vector<1x256xf32>
    %403 = arith.mulf %402, %388 : vector<1x256xf32>
    %404 = arith.addf %386, %403 : vector<1x256xf32>
    %c255_i32_38 = arith.constant 255 : i32
    %405 = tpu.dynamic_rotate %5 by %c255_i32_38 dim 1 : vector<1x256xf32>, i32 -> vector<1x256xf32>
    %406 = arith.mulf %405, %368 : vector<1x256xf32>
    %c82 = arith.constant 82 : index
    %407 = memref.load %arg3[%c82] : memref<144xf32, #tpu.memory_space<smem>>
    %408 = vector.broadcast %407 : f32 to vector<1x256xf32>
    %409 = arith.mulf %408, %406 : vector<1x256xf32>
    %410 = arith.addf %392, %409 : vector<1x256xf32>
    %c86 = arith.constant 86 : index
    %411 = memref.load %arg3[%c86] : memref<144xf32, #tpu.memory_space<smem>>
    %412 = vector.broadcast %411 : f32 to vector<1x256xf32>
    %413 = arith.mulf %412, %406 : vector<1x256xf32>
    %414 = arith.addf %396, %413 : vector<1x256xf32>
    %c90 = arith.constant 90 : index
    %415 = memref.load %arg3[%c90] : memref<144xf32, #tpu.memory_space<smem>>
    %416 = vector.broadcast %415 : f32 to vector<1x256xf32>
    %417 = arith.mulf %416, %406 : vector<1x256xf32>
    %418 = arith.addf %400, %417 : vector<1x256xf32>
    %c94 = arith.constant 94 : index
    %419 = memref.load %arg3[%c94] : memref<144xf32, #tpu.memory_space<smem>>
    %420 = vector.broadcast %419 : f32 to vector<1x256xf32>
    %421 = arith.mulf %420, %406 : vector<1x256xf32>
    %422 = arith.addf %404, %421 : vector<1x256xf32>
    %c255_i32_39 = arith.constant 255 : i32
    %423 = tpu.dynamic_rotate %7 by %c255_i32_39 dim 1 : vector<1x256xf32>, i32 -> vector<1x256xf32>
    %424 = arith.mulf %423, %368 : vector<1x256xf32>
    %c83 = arith.constant 83 : index
    %425 = memref.load %arg3[%c83] : memref<144xf32, #tpu.memory_space<smem>>
    %426 = vector.broadcast %425 : f32 to vector<1x256xf32>
    %427 = arith.mulf %426, %424 : vector<1x256xf32>
    %428 = arith.addf %410, %427 : vector<1x256xf32>
    %c87 = arith.constant 87 : index
    %429 = memref.load %arg3[%c87] : memref<144xf32, #tpu.memory_space<smem>>
    %430 = vector.broadcast %429 : f32 to vector<1x256xf32>
    %431 = arith.mulf %430, %424 : vector<1x256xf32>
    %432 = arith.addf %414, %431 : vector<1x256xf32>
    %c91 = arith.constant 91 : index
    %433 = memref.load %arg3[%c91] : memref<144xf32, #tpu.memory_space<smem>>
    %434 = vector.broadcast %433 : f32 to vector<1x256xf32>
    %435 = arith.mulf %434, %424 : vector<1x256xf32>
    %436 = arith.addf %418, %435 : vector<1x256xf32>
    %c95 = arith.constant 95 : index
    %437 = memref.load %arg3[%c95] : memref<144xf32, #tpu.memory_space<smem>>
    %438 = vector.broadcast %437 : f32 to vector<1x256xf32>
    %439 = arith.mulf %438, %424 : vector<1x256xf32>
    %440 = arith.addf %422, %439 : vector<1x256xf32>
    %c6_40 = arith.constant 6 : index
    %c0_41 = arith.constant 0 : index
    %441 = vector.load %arg2[%c6_40, %c0_41] : memref<9x256xf32, #tpu.memory_space<vmem>>, vector<1x256xf32>
    %c241_i32 = arith.constant 241 : i32
    %442 = tpu.dynamic_rotate %1 by %c241_i32 dim 1 : vector<1x256xf32>, i32 -> vector<1x256xf32>
    %443 = arith.mulf %442, %441 : vector<1x256xf32>
    %c96 = arith.constant 96 : index
    %444 = memref.load %arg3[%c96] : memref<144xf32, #tpu.memory_space<smem>>
    %445 = vector.broadcast %444 : f32 to vector<1x256xf32>
    %446 = arith.mulf %445, %443 : vector<1x256xf32>
    %447 = arith.addf %428, %446 : vector<1x256xf32>
    %c100 = arith.constant 100 : index
    %448 = memref.load %arg3[%c100] : memref<144xf32, #tpu.memory_space<smem>>
    %449 = vector.broadcast %448 : f32 to vector<1x256xf32>
    %450 = arith.mulf %449, %443 : vector<1x256xf32>
    %451 = arith.addf %432, %450 : vector<1x256xf32>
    %c104 = arith.constant 104 : index
    %452 = memref.load %arg3[%c104] : memref<144xf32, #tpu.memory_space<smem>>
    %453 = vector.broadcast %452 : f32 to vector<1x256xf32>
    %454 = arith.mulf %453, %443 : vector<1x256xf32>
    %455 = arith.addf %436, %454 : vector<1x256xf32>
    %c108 = arith.constant 108 : index
    %456 = memref.load %arg3[%c108] : memref<144xf32, #tpu.memory_space<smem>>
    %457 = vector.broadcast %456 : f32 to vector<1x256xf32>
    %458 = arith.mulf %457, %443 : vector<1x256xf32>
    %459 = arith.addf %440, %458 : vector<1x256xf32>
    %c241_i32_42 = arith.constant 241 : i32
    %460 = tpu.dynamic_rotate %3 by %c241_i32_42 dim 1 : vector<1x256xf32>, i32 -> vector<1x256xf32>
    %461 = arith.mulf %460, %441 : vector<1x256xf32>
    %c97 = arith.constant 97 : index
    %462 = memref.load %arg3[%c97] : memref<144xf32, #tpu.memory_space<smem>>
    %463 = vector.broadcast %462 : f32 to vector<1x256xf32>
    %464 = arith.mulf %463, %461 : vector<1x256xf32>
    %465 = arith.addf %447, %464 : vector<1x256xf32>
    %c101 = arith.constant 101 : index
    %466 = memref.load %arg3[%c101] : memref<144xf32, #tpu.memory_space<smem>>
    %467 = vector.broadcast %466 : f32 to vector<1x256xf32>
    %468 = arith.mulf %467, %461 : vector<1x256xf32>
    %469 = arith.addf %451, %468 : vector<1x256xf32>
    %c105 = arith.constant 105 : index
    %470 = memref.load %arg3[%c105] : memref<144xf32, #tpu.memory_space<smem>>
    %471 = vector.broadcast %470 : f32 to vector<1x256xf32>
    %472 = arith.mulf %471, %461 : vector<1x256xf32>
    %473 = arith.addf %455, %472 : vector<1x256xf32>
    %c109 = arith.constant 109 : index
    %474 = memref.load %arg3[%c109] : memref<144xf32, #tpu.memory_space<smem>>
    %475 = vector.broadcast %474 : f32 to vector<1x256xf32>
    %476 = arith.mulf %475, %461 : vector<1x256xf32>
    %477 = arith.addf %459, %476 : vector<1x256xf32>
    %c241_i32_43 = arith.constant 241 : i32
    %478 = tpu.dynamic_rotate %5 by %c241_i32_43 dim 1 : vector<1x256xf32>, i32 -> vector<1x256xf32>
    %479 = arith.mulf %478, %441 : vector<1x256xf32>
    %c98 = arith.constant 98 : index
    %480 = memref.load %arg3[%c98] : memref<144xf32, #tpu.memory_space<smem>>
    %481 = vector.broadcast %480 : f32 to vector<1x256xf32>
    %482 = arith.mulf %481, %479 : vector<1x256xf32>
    %483 = arith.addf %465, %482 : vector<1x256xf32>
    %c102 = arith.constant 102 : index
    %484 = memref.load %arg3[%c102] : memref<144xf32, #tpu.memory_space<smem>>
    %485 = vector.broadcast %484 : f32 to vector<1x256xf32>
    %486 = arith.mulf %485, %479 : vector<1x256xf32>
    %487 = arith.addf %469, %486 : vector<1x256xf32>
    %c106 = arith.constant 106 : index
    %488 = memref.load %arg3[%c106] : memref<144xf32, #tpu.memory_space<smem>>
    %489 = vector.broadcast %488 : f32 to vector<1x256xf32>
    %490 = arith.mulf %489, %479 : vector<1x256xf32>
    %491 = arith.addf %473, %490 : vector<1x256xf32>
    %c110 = arith.constant 110 : index
    %492 = memref.load %arg3[%c110] : memref<144xf32, #tpu.memory_space<smem>>
    %493 = vector.broadcast %492 : f32 to vector<1x256xf32>
    %494 = arith.mulf %493, %479 : vector<1x256xf32>
    %495 = arith.addf %477, %494 : vector<1x256xf32>
    %c241_i32_44 = arith.constant 241 : i32
    %496 = tpu.dynamic_rotate %7 by %c241_i32_44 dim 1 : vector<1x256xf32>, i32 -> vector<1x256xf32>
    %497 = arith.mulf %496, %441 : vector<1x256xf32>
    %c99 = arith.constant 99 : index
    %498 = memref.load %arg3[%c99] : memref<144xf32, #tpu.memory_space<smem>>
    %499 = vector.broadcast %498 : f32 to vector<1x256xf32>
    %500 = arith.mulf %499, %497 : vector<1x256xf32>
    %501 = arith.addf %483, %500 : vector<1x256xf32>
    %c103 = arith.constant 103 : index
    %502 = memref.load %arg3[%c103] : memref<144xf32, #tpu.memory_space<smem>>
    %503 = vector.broadcast %502 : f32 to vector<1x256xf32>
    %504 = arith.mulf %503, %497 : vector<1x256xf32>
    %505 = arith.addf %487, %504 : vector<1x256xf32>
    %c107 = arith.constant 107 : index
    %506 = memref.load %arg3[%c107] : memref<144xf32, #tpu.memory_space<smem>>
    %507 = vector.broadcast %506 : f32 to vector<1x256xf32>
    %508 = arith.mulf %507, %497 : vector<1x256xf32>
    %509 = arith.addf %491, %508 : vector<1x256xf32>
    %c111 = arith.constant 111 : index
    %510 = memref.load %arg3[%c111] : memref<144xf32, #tpu.memory_space<smem>>
    %511 = vector.broadcast %510 : f32 to vector<1x256xf32>
    %512 = arith.mulf %511, %497 : vector<1x256xf32>
    %513 = arith.addf %495, %512 : vector<1x256xf32>
    %c7_45 = arith.constant 7 : index
    %c0_46 = arith.constant 0 : index
    %514 = vector.load %arg2[%c7_45, %c0_46] : memref<9x256xf32, #tpu.memory_space<vmem>>, vector<1x256xf32>
    %c240_i32 = arith.constant 240 : i32
    %515 = tpu.dynamic_rotate %1 by %c240_i32 dim 1 : vector<1x256xf32>, i32 -> vector<1x256xf32>
    %516 = arith.mulf %515, %514 : vector<1x256xf32>
    %c112 = arith.constant 112 : index
    %517 = memref.load %arg3[%c112] : memref<144xf32, #tpu.memory_space<smem>>
    %518 = vector.broadcast %517 : f32 to vector<1x256xf32>
    %519 = arith.mulf %518, %516 : vector<1x256xf32>
    %520 = arith.addf %501, %519 : vector<1x256xf32>
    %c116 = arith.constant 116 : index
    %521 = memref.load %arg3[%c116] : memref<144xf32, #tpu.memory_space<smem>>
    %522 = vector.broadcast %521 : f32 to vector<1x256xf32>
    %523 = arith.mulf %522, %516 : vector<1x256xf32>
    %524 = arith.addf %505, %523 : vector<1x256xf32>
    %c120 = arith.constant 120 : index
    %525 = memref.load %arg3[%c120] : memref<144xf32, #tpu.memory_space<smem>>
    %526 = vector.broadcast %525 : f32 to vector<1x256xf32>
    %527 = arith.mulf %526, %516 : vector<1x256xf32>
    %528 = arith.addf %509, %527 : vector<1x256xf32>
    %c124 = arith.constant 124 : index
    %529 = memref.load %arg3[%c124] : memref<144xf32, #tpu.memory_space<smem>>
    %530 = vector.broadcast %529 : f32 to vector<1x256xf32>
    %531 = arith.mulf %530, %516 : vector<1x256xf32>
    %532 = arith.addf %513, %531 : vector<1x256xf32>
    %c240_i32_47 = arith.constant 240 : i32
    %533 = tpu.dynamic_rotate %3 by %c240_i32_47 dim 1 : vector<1x256xf32>, i32 -> vector<1x256xf32>
    %534 = arith.mulf %533, %514 : vector<1x256xf32>
    %c113 = arith.constant 113 : index
    %535 = memref.load %arg3[%c113] : memref<144xf32, #tpu.memory_space<smem>>
    %536 = vector.broadcast %535 : f32 to vector<1x256xf32>
    %537 = arith.mulf %536, %534 : vector<1x256xf32>
    %538 = arith.addf %520, %537 : vector<1x256xf32>
    %c117 = arith.constant 117 : index
    %539 = memref.load %arg3[%c117] : memref<144xf32, #tpu.memory_space<smem>>
    %540 = vector.broadcast %539 : f32 to vector<1x256xf32>
    %541 = arith.mulf %540, %534 : vector<1x256xf32>
    %542 = arith.addf %524, %541 : vector<1x256xf32>
    %c121 = arith.constant 121 : index
    %543 = memref.load %arg3[%c121] : memref<144xf32, #tpu.memory_space<smem>>
    %544 = vector.broadcast %543 : f32 to vector<1x256xf32>
    %545 = arith.mulf %544, %534 : vector<1x256xf32>
    %546 = arith.addf %528, %545 : vector<1x256xf32>
    %c125 = arith.constant 125 : index
    %547 = memref.load %arg3[%c125] : memref<144xf32, #tpu.memory_space<smem>>
    %548 = vector.broadcast %547 : f32 to vector<1x256xf32>
    %549 = arith.mulf %548, %534 : vector<1x256xf32>
    %550 = arith.addf %532, %549 : vector<1x256xf32>
    %c240_i32_48 = arith.constant 240 : i32
    %551 = tpu.dynamic_rotate %5 by %c240_i32_48 dim 1 : vector<1x256xf32>, i32 -> vector<1x256xf32>
    %552 = arith.mulf %551, %514 : vector<1x256xf32>
    %c114 = arith.constant 114 : index
    %553 = memref.load %arg3[%c114] : memref<144xf32, #tpu.memory_space<smem>>
    %554 = vector.broadcast %553 : f32 to vector<1x256xf32>
    %555 = arith.mulf %554, %552 : vector<1x256xf32>
    %556 = arith.addf %538, %555 : vector<1x256xf32>
    %c118 = arith.constant 118 : index
    %557 = memref.load %arg3[%c118] : memref<144xf32, #tpu.memory_space<smem>>
    %558 = vector.broadcast %557 : f32 to vector<1x256xf32>
    %559 = arith.mulf %558, %552 : vector<1x256xf32>
    %560 = arith.addf %542, %559 : vector<1x256xf32>
    %c122 = arith.constant 122 : index
    %561 = memref.load %arg3[%c122] : memref<144xf32, #tpu.memory_space<smem>>
    %562 = vector.broadcast %561 : f32 to vector<1x256xf32>
    %563 = arith.mulf %562, %552 : vector<1x256xf32>
    %564 = arith.addf %546, %563 : vector<1x256xf32>
    %c126 = arith.constant 126 : index
    %565 = memref.load %arg3[%c126] : memref<144xf32, #tpu.memory_space<smem>>
    %566 = vector.broadcast %565 : f32 to vector<1x256xf32>
    %567 = arith.mulf %566, %552 : vector<1x256xf32>
    %568 = arith.addf %550, %567 : vector<1x256xf32>
    %c240_i32_49 = arith.constant 240 : i32
    %569 = tpu.dynamic_rotate %7 by %c240_i32_49 dim 1 : vector<1x256xf32>, i32 -> vector<1x256xf32>
    %570 = arith.mulf %569, %514 : vector<1x256xf32>
    %c115 = arith.constant 115 : index
    %571 = memref.load %arg3[%c115] : memref<144xf32, #tpu.memory_space<smem>>
    %572 = vector.broadcast %571 : f32 to vector<1x256xf32>
    %573 = arith.mulf %572, %570 : vector<1x256xf32>
    %574 = arith.addf %556, %573 : vector<1x256xf32>
    %c119 = arith.constant 119 : index
    %575 = memref.load %arg3[%c119] : memref<144xf32, #tpu.memory_space<smem>>
    %576 = vector.broadcast %575 : f32 to vector<1x256xf32>
    %577 = arith.mulf %576, %570 : vector<1x256xf32>
    %578 = arith.addf %560, %577 : vector<1x256xf32>
    %c123 = arith.constant 123 : index
    %579 = memref.load %arg3[%c123] : memref<144xf32, #tpu.memory_space<smem>>
    %580 = vector.broadcast %579 : f32 to vector<1x256xf32>
    %581 = arith.mulf %580, %570 : vector<1x256xf32>
    %582 = arith.addf %564, %581 : vector<1x256xf32>
    %c127 = arith.constant 127 : index
    %583 = memref.load %arg3[%c127] : memref<144xf32, #tpu.memory_space<smem>>
    %584 = vector.broadcast %583 : f32 to vector<1x256xf32>
    %585 = arith.mulf %584, %570 : vector<1x256xf32>
    %586 = arith.addf %568, %585 : vector<1x256xf32>
    %c8_50 = arith.constant 8 : index
    %c0_51 = arith.constant 0 : index
    %587 = vector.load %arg2[%c8_50, %c0_51] : memref<9x256xf32, #tpu.memory_space<vmem>>, vector<1x256xf32>
    %c239_i32 = arith.constant 239 : i32
    %588 = tpu.dynamic_rotate %1 by %c239_i32 dim 1 : vector<1x256xf32>, i32 -> vector<1x256xf32>
    %589 = arith.mulf %588, %587 : vector<1x256xf32>
    %c128 = arith.constant 128 : index
    %590 = memref.load %arg3[%c128] : memref<144xf32, #tpu.memory_space<smem>>
    %591 = vector.broadcast %590 : f32 to vector<1x256xf32>
    %592 = arith.mulf %591, %589 : vector<1x256xf32>
    %593 = arith.addf %574, %592 : vector<1x256xf32>
    %c132 = arith.constant 132 : index
    %594 = memref.load %arg3[%c132] : memref<144xf32, #tpu.memory_space<smem>>
    %595 = vector.broadcast %594 : f32 to vector<1x256xf32>
    %596 = arith.mulf %595, %589 : vector<1x256xf32>
    %597 = arith.addf %578, %596 : vector<1x256xf32>
    %c136 = arith.constant 136 : index
    %598 = memref.load %arg3[%c136] : memref<144xf32, #tpu.memory_space<smem>>
    %599 = vector.broadcast %598 : f32 to vector<1x256xf32>
    %600 = arith.mulf %599, %589 : vector<1x256xf32>
    %601 = arith.addf %582, %600 : vector<1x256xf32>
    %c140 = arith.constant 140 : index
    %602 = memref.load %arg3[%c140] : memref<144xf32, #tpu.memory_space<smem>>
    %603 = vector.broadcast %602 : f32 to vector<1x256xf32>
    %604 = arith.mulf %603, %589 : vector<1x256xf32>
    %605 = arith.addf %586, %604 : vector<1x256xf32>
    %c239_i32_52 = arith.constant 239 : i32
    %606 = tpu.dynamic_rotate %3 by %c239_i32_52 dim 1 : vector<1x256xf32>, i32 -> vector<1x256xf32>
    %607 = arith.mulf %606, %587 : vector<1x256xf32>
    %c129 = arith.constant 129 : index
    %608 = memref.load %arg3[%c129] : memref<144xf32, #tpu.memory_space<smem>>
    %609 = vector.broadcast %608 : f32 to vector<1x256xf32>
    %610 = arith.mulf %609, %607 : vector<1x256xf32>
    %611 = arith.addf %593, %610 : vector<1x256xf32>
    %c133 = arith.constant 133 : index
    %612 = memref.load %arg3[%c133] : memref<144xf32, #tpu.memory_space<smem>>
    %613 = vector.broadcast %612 : f32 to vector<1x256xf32>
    %614 = arith.mulf %613, %607 : vector<1x256xf32>
    %615 = arith.addf %597, %614 : vector<1x256xf32>
    %c137 = arith.constant 137 : index
    %616 = memref.load %arg3[%c137] : memref<144xf32, #tpu.memory_space<smem>>
    %617 = vector.broadcast %616 : f32 to vector<1x256xf32>
    %618 = arith.mulf %617, %607 : vector<1x256xf32>
    %619 = arith.addf %601, %618 : vector<1x256xf32>
    %c141 = arith.constant 141 : index
    %620 = memref.load %arg3[%c141] : memref<144xf32, #tpu.memory_space<smem>>
    %621 = vector.broadcast %620 : f32 to vector<1x256xf32>
    %622 = arith.mulf %621, %607 : vector<1x256xf32>
    %623 = arith.addf %605, %622 : vector<1x256xf32>
    %c239_i32_53 = arith.constant 239 : i32
    %624 = tpu.dynamic_rotate %5 by %c239_i32_53 dim 1 : vector<1x256xf32>, i32 -> vector<1x256xf32>
    %625 = arith.mulf %624, %587 : vector<1x256xf32>
    %c130 = arith.constant 130 : index
    %626 = memref.load %arg3[%c130] : memref<144xf32, #tpu.memory_space<smem>>
    %627 = vector.broadcast %626 : f32 to vector<1x256xf32>
    %628 = arith.mulf %627, %625 : vector<1x256xf32>
    %629 = arith.addf %611, %628 : vector<1x256xf32>
    %c134 = arith.constant 134 : index
    %630 = memref.load %arg3[%c134] : memref<144xf32, #tpu.memory_space<smem>>
    %631 = vector.broadcast %630 : f32 to vector<1x256xf32>
    %632 = arith.mulf %631, %625 : vector<1x256xf32>
    %633 = arith.addf %615, %632 : vector<1x256xf32>
    %c138 = arith.constant 138 : index
    %634 = memref.load %arg3[%c138] : memref<144xf32, #tpu.memory_space<smem>>
    %635 = vector.broadcast %634 : f32 to vector<1x256xf32>
    %636 = arith.mulf %635, %625 : vector<1x256xf32>
    %637 = arith.addf %619, %636 : vector<1x256xf32>
    %c142 = arith.constant 142 : index
    %638 = memref.load %arg3[%c142] : memref<144xf32, #tpu.memory_space<smem>>
    %639 = vector.broadcast %638 : f32 to vector<1x256xf32>
    %640 = arith.mulf %639, %625 : vector<1x256xf32>
    %641 = arith.addf %623, %640 : vector<1x256xf32>
    %c239_i32_54 = arith.constant 239 : i32
    %642 = tpu.dynamic_rotate %7 by %c239_i32_54 dim 1 : vector<1x256xf32>, i32 -> vector<1x256xf32>
    %643 = arith.mulf %642, %587 : vector<1x256xf32>
    %c131 = arith.constant 131 : index
    %644 = memref.load %arg3[%c131] : memref<144xf32, #tpu.memory_space<smem>>
    %645 = vector.broadcast %644 : f32 to vector<1x256xf32>
    %646 = arith.mulf %645, %643 : vector<1x256xf32>
    %647 = arith.addf %629, %646 : vector<1x256xf32>
    %c135 = arith.constant 135 : index
    %648 = memref.load %arg3[%c135] : memref<144xf32, #tpu.memory_space<smem>>
    %649 = vector.broadcast %648 : f32 to vector<1x256xf32>
    %650 = arith.mulf %649, %643 : vector<1x256xf32>
    %651 = arith.addf %633, %650 : vector<1x256xf32>
    %c139 = arith.constant 139 : index
    %652 = memref.load %arg3[%c139] : memref<144xf32, #tpu.memory_space<smem>>
    %653 = vector.broadcast %652 : f32 to vector<1x256xf32>
    %654 = arith.mulf %653, %643 : vector<1x256xf32>
    %655 = arith.addf %637, %654 : vector<1x256xf32>
    %c143 = arith.constant 143 : index
    %656 = memref.load %arg3[%c143] : memref<144xf32, #tpu.memory_space<smem>>
    %657 = vector.broadcast %656 : f32 to vector<1x256xf32>
    %658 = arith.mulf %657, %643 : vector<1x256xf32>
    %659 = arith.addf %641, %658 : vector<1x256xf32>
    %c0_55 = arith.constant 0 : index
    %660 = memref.load %arg4[%c0_55] : memref<16xf32, #tpu.memory_space<smem>>
    %661 = vector.broadcast %660 : f32 to vector<1x256xf32>
    %662 = arith.addf %647, %661 : vector<1x256xf32>
    %c4_56 = arith.constant 4 : index
    %663 = memref.load %arg4[%c4_56] : memref<16xf32, #tpu.memory_space<smem>>
    %cst_57 = arith.constant 5.000000e-01 : f32
    %664 = vector.broadcast %cst_57 : f32 to vector<1x256xf32>
    %665 = arith.mulf %664, %662 : vector<1x256xf32>
    %666 = math.tanh %665 : vector<1x256xf32>
    %667 = vector.broadcast %663 : f32 to vector<1x256xf32>
    %668 = arith.mulf %667, %666 : vector<1x256xf32>
    %669 = arith.addf %1, %668 : vector<1x256xf32>
    %c8_58 = arith.constant 8 : index
    %670 = memref.load %arg4[%c8_58] : memref<16xf32, #tpu.memory_space<smem>>
    %c12_59 = arith.constant 12 : index
    %671 = memref.load %arg4[%c12_59] : memref<16xf32, #tpu.memory_space<smem>>
    %672 = vector.broadcast %670 : f32 to vector<1x256xf32>
    %673 = arith.maximumf %672, %669 : vector<1x256xf32>
    %674 = vector.broadcast %671 : f32 to vector<1x256xf32>
    %675 = arith.minimumf %674, %673 : vector<1x256xf32>
    %c0_60 = arith.constant 0 : index
    %c0_61 = arith.constant 0 : index
    %c0_62 = arith.constant 0 : index
    %676 = vector.load %arg5[%c0_60, %c0_61, %c0_62] : memref<1x4x256xf32, #tpu.memory_space<vmem>>, vector<1x1x256xf32>
    %677 = vector.shape_cast %676 : vector<1x1x256xf32> to vector<1x256xf32>
    %678 = vector.shape_cast %675 : vector<1x256xf32> to vector<1x1x256xf32>
    tpu.vector_store %arg5[%c0_60, %c0_61, %c0_62], %678 {strides = array<i32>} : memref<1x4x256xf32, #tpu.memory_space<vmem>>, vector<1x1x256xf32>,
    %c1_63 = arith.constant 1 : index
    %679 = memref.load %arg4[%c1_63] : memref<16xf32, #tpu.memory_space<smem>>
    %680 = vector.broadcast %679 : f32 to vector<1x256xf32>
    %681 = arith.addf %651, %680 : vector<1x256xf32>
    %c5_64 = arith.constant 5 : index
    %682 = memref.load %arg4[%c5_64] : memref<16xf32, #tpu.memory_space<smem>>
    %cst_65 = arith.constant 5.000000e-01 : f32
    %683 = vector.broadcast %cst_65 : f32 to vector<1x256xf32>
    %684 = arith.mulf %683, %681 : vector<1x256xf32>
    %685 = math.tanh %684 : vector<1x256xf32>
    %686 = vector.broadcast %682 : f32 to vector<1x256xf32>
    %687 = arith.mulf %686, %685 : vector<1x256xf32>
    %688 = arith.addf %3, %687 : vector<1x256xf32>
    %c9_66 = arith.constant 9 : index
    %689 = memref.load %arg4[%c9_66] : memref<16xf32, #tpu.memory_space<smem>>
    %c13_67 = arith.constant 13 : index
    %690 = memref.load %arg4[%c13_67] : memref<16xf32, #tpu.memory_space<smem>>
    %691 = vector.broadcast %689 : f32 to vector<1x256xf32>
    %692 = arith.maximumf %691, %688 : vector<1x256xf32>
    %693 = vector.broadcast %690 : f32 to vector<1x256xf32>
    %694 = arith.minimumf %693, %692 : vector<1x256xf32>
    %c0_68 = arith.constant 0 : index
    %c1_69 = arith.constant 1 : index
    %c0_70 = arith.constant 0 : index
    %695 = vector.load %arg5[%c0_68, %c1_69, %c0_70] : memref<1x4x256xf32, #tpu.memory_space<vmem>>, vector<1x1x256xf32>
    %696 = vector.shape_cast %695 : vector<1x1x256xf32> to vector<1x256xf32>
    %697 = vector.shape_cast %694 : vector<1x256xf32> to vector<1x1x256xf32>
    tpu.vector_store %arg5[%c0_68, %c1_69, %c0_70], %697 {strides = array<i32>} : memref<1x4x256xf32, #tpu.memory_space<vmem>>, vector<1x1x256xf32>,
    %c2_71 = arith.constant 2 : index
    %698 = memref.load %arg4[%c2_71] : memref<16xf32, #tpu.memory_space<smem>>
    %699 = vector.broadcast %698 : f32 to vector<1x256xf32>
    %700 = arith.addf %655, %699 : vector<1x256xf32>
    %c6_72 = arith.constant 6 : index
    %701 = memref.load %arg4[%c6_72] : memref<16xf32, #tpu.memory_space<smem>>
    %cst_73 = arith.constant 5.000000e-01 : f32
    %702 = vector.broadcast %cst_73 : f32 to vector<1x256xf32>
    %703 = arith.mulf %702, %700 : vector<1x256xf32>
    %704 = math.tanh %703 : vector<1x256xf32>
    %705 = vector.broadcast %701 : f32 to vector<1x256xf32>
    %706 = arith.mulf %705, %704 : vector<1x256xf32>
    %707 = arith.addf %5, %706 : vector<1x256xf32>
    %c10_74 = arith.constant 10 : index
    %708 = memref.load %arg4[%c10_74] : memref<16xf32, #tpu.memory_space<smem>>
    %c14_75 = arith.constant 14 : index
    %709 = memref.load %arg4[%c14_75] : memref<16xf32, #tpu.memory_space<smem>>
    %710 = vector.broadcast %708 : f32 to vector<1x256xf32>
    %711 = arith.maximumf %710, %707 : vector<1x256xf32>
    %712 = vector.broadcast %709 : f32 to vector<1x256xf32>
    %713 = arith.minimumf %712, %711 : vector<1x256xf32>
    %c0_76 = arith.constant 0 : index
    %c2_77 = arith.constant 2 : index
    %c0_78 = arith.constant 0 : index
    %714 = vector.load %arg5[%c0_76, %c2_77, %c0_78] : memref<1x4x256xf32, #tpu.memory_space<vmem>>, vector<1x1x256xf32>
    %715 = vector.shape_cast %714 : vector<1x1x256xf32> to vector<1x256xf32>
    %716 = vector.shape_cast %713 : vector<1x256xf32> to vector<1x1x256xf32>
    tpu.vector_store %arg5[%c0_76, %c2_77, %c0_78], %716 {strides = array<i32>} : memref<1x4x256xf32, #tpu.memory_space<vmem>>, vector<1x1x256xf32>,
    %c3_79 = arith.constant 3 : index
    %717 = memref.load %arg4[%c3_79] : memref<16xf32, #tpu.memory_space<smem>>
    %718 = vector.broadcast %717 : f32 to vector<1x256xf32>
    %719 = arith.addf %659, %718 : vector<1x256xf32>
    %c7_80 = arith.constant 7 : index
    %720 = memref.load %arg4[%c7_80] : memref<16xf32, #tpu.memory_space<smem>>
    %cst_81 = arith.constant 5.000000e-01 : f32
    %721 = vector.broadcast %cst_81 : f32 to vector<1x256xf32>
    %722 = arith.mulf %721, %719 : vector<1x256xf32>
    %723 = math.tanh %722 : vector<1x256xf32>
    %724 = vector.broadcast %720 : f32 to vector<1x256xf32>
    %725 = arith.mulf %724, %723 : vector<1x256xf32>
    %726 = arith.addf %7, %725 : vector<1x256xf32>
    %c11_82 = arith.constant 11 : index
    %727 = memref.load %arg4[%c11_82] : memref<16xf32, #tpu.memory_space<smem>>
    %c15_83 = arith.constant 15 : index
    %728 = memref.load %arg4[%c15_83] : memref<16xf32, #tpu.memory_space<smem>>
    %729 = vector.broadcast %727 : f32 to vector<1x256xf32>
    %730 = arith.maximumf %729, %726 : vector<1x256xf32>
    %731 = vector.broadcast %728 : f32 to vector<1x256xf32>
    %732 = arith.minimumf %731, %730 : vector<1x256xf32>
    %c0_84 = arith.constant 0 : index
    %c3_85 = arith.constant 3 : index
    %c0_86 = arith.constant 0 : index
    %733 = vector.load %arg5[%c0_84, %c3_85, %c0_86] : memref<1x4x256xf32, #tpu.memory_space<vmem>>, vector<1x1x256xf32>
    %734 = vector.shape_cast %733 : vector<1x1x256xf32> to vector<1x256xf32>
    %735 = vector.shape_cast %732 : vector<1x256xf32> to vector<1x1x256xf32>
    tpu.vector_store %arg5[%c0_84, %c3_85, %c0_86], %735 {strides = array<i32>} : memref<1x4x256xf32, #tpu.memory_space<vmem>>, vector<1x1x256xf32>,
    return
  }
  func.func @transform_0(%arg0: i32) -> (i32, i32, i32) {
    %c0_i32 = arith.constant 0 : i32
    %c0_i32_0 = arith.constant 0 : i32
    %c0_i32_1 = arith.constant 0 : i32
    return %arg0, %c0_i32, %c0_i32_0 : i32, i32, i32
  }
  func.func @transform_1(%arg0: i32) -> (i32, i32) {
    %c0_i32 = arith.constant 0 : i32
    %c0_i32_0 = arith.constant 0 : i32
    %c0_i32_1 = arith.constant 0 : i32
    return %c0_i32, %c0_i32_0 : i32, i32
  }
  func.func @transform_2(%arg0: i32) -> i32 {
    %c0_i32 = arith.constant 0 : i32
    %c0_i32_0 = arith.constant 0 : i32
    return %c0_i32 : i32
  }
  func.func @transform_3(%arg0: i32) -> i32 {
    %c0_i32 = arith.constant 0 : i32
    %c0_i32_0 = arith.constant 0 : i32
    return %c0_i32 : i32
  }
  func.func @transform_4(%arg0: i32) -> (i32, i32, i32) {
    %c0_i32 = arith.constant 0 : i32
    %c0_i32_0 = arith.constant 0 : i32
    %c0_i32_1 = arith.constant 0 : i32
    return %arg0, %c0_i32, %c0_i32_0 : i32, i32, i32
  }
}

</mosaic_0001>

<bundles_post_ra>
// kernel: robustifier_forward.1
= control target key start
LH: loop header
LB: loop body
LE: loop exit
PB: predicated region body
PF: predicated region fallthrough
CT: control target
= control target key end

     0   :  { %9 = vsyncpa [#allocation3], 0  ;;  %s3061_s0 = inlined_call_operand.vmem [shape: f32[2,4,256], index: 0, kind: input, shape index: {}]   ;;  %s3062_s1 = inlined_call_operand.vmem [shape: f32[9,256], index: 1, kind: input, shape index: {}]   ;;  %s3063_s2 = inlined_call_operand.vmem [shape: f32[144], index: 2, kind: input, shape index: {}]   ;;  %s3064_s3 = inlined_call_operand.vmem [shape: f32[16], index: 3, kind: input, shape index: {}]   ;;  %s3065_s4 = inlined_call_operand.vmem [shape: f32[2,4,256], index: 4, kind: output, shape index: {}]  }
   0x1   :  { %10 = vsyncpa [#allocation5], 0  ;;  %s2016_s15 = smov 0  }
   0x2 LB: > { %s1686_s16 = sadd.s32 4294967295, %s1979_s15   ;;  %p1688_p0 = scmp.ge.s32.totalorder %s1979_s15, 1  ;;  %s1979_s15 = sphi %s2016_s15, %s16_s15  }
   0x3   : > { %p136_p1 = scmp.lt.s32.totalorder %s1979_s15, 3  ;;  %s151_s19 = sshll.u32 %s3063_s2, 4  ;;  %s152_s19 = int_to_ptr.vmem [resolvable:$true] %s151_s19 }
   0x4   : > { %p1889_p3 = scmp.eq.s32.totalorder %s1686_s16, 0  ;;  %s161_s22 = sshll.u32 %s3064_s3, 4  ;;  %s162_s22 = int_to_ptr.vmem [resolvable:$true] %s161_s22 }
   0x5   : > { %p137_p2 = pnand %p1688_p0, %p136_p1  ;;  %s1981_s23 = smov [#allocation2]  }
   0x6   : > { %s1982_s24 = smov [#allocation4]  }
   0x7   : > { %p1882_p4 = pneg %p137_p2 }
   0x8   : > { %182 = sbr.rel (%p137_p2) target bundleno = 391 (0x187), region = 36 }
   0x9   : > { %p1883_p5 = pnand %p1889_p3, %p1882_p4 }
   0xb   : > { %1885 = dma.vmem_to_smem (!%p1883_p5), %s152_s19, 32, %s1981_s23, [#allocation3]  }
   0xc   : > { %1888 = dma.vmem_to_smem (!%p1883_p5), %s162_s22, 16, %s1982_s24, [#allocation5]  }
   0xd   : > { %1970 = dma.done.wait (%p1889_p3), [#allocation3], 32  }
   0xe   : > { %1972 = vsyncadd (%p1889_p3), [#allocation3], 4294967264 }
   0xf   : > { %1974 = dma.done.wait (%p1889_p3), [#allocation5], 16  }
  0x10   : > { %1976 = vsyncadd (%p1889_p3), [#allocation5], 4294967280 }
  0x11   : > { %194 = sfence }
  0x12   : > { %p215_p6 = scmp.lt.s32.totalorder %s1686_s16, 1  ;;  %s1983_s29 = smov 17   ;;  %v242_v12 = vlaneseq  ;;  %v232_v18 = vld [vmem:[%s3062_s1] ss:$8 sm:$0x3]  ;;  %vm1516_vm8 = vcmask 1040384  }
  0x13   : > { %s1984_s30 = smov 16   ;;  %s1985_s5 = smov 15   ;;  %v2156_v19 = vperm.slane %v232_v18, 0  ;;  %v2158_v20 = vperm.slane %v232_v18, 1 }
  0x14   : > { %s3069_s16 = smov (!%p215_p6, %s1686_s16), 1  ;;  %s1986_s6 = smov 1   ;;  %v2102_v14 = vand.u32 127, %v242_v12  ;;  %v2209_v51 = vld [vmem:[%s3062_s1 + $0x1] ss:$8 sm:$0x3] }
  0x15   : > { %s1872_s25 = sshll.u32 %s3069_s16, 3  ;;  %s1987_s7 = smov 127   ;;  %v2234_v61 = vperm.slane %v2209_v51, 0  ;;  %vm3031_vm9 = vcmp.lt.s32.totalorder %v242_v12, 256 }
  0x16   : > { %s2043_s28 = scalar_lea.vmem %s3061_s0, %s1872_s25  ;;  %s2106_s8 = sld [smem:[#allocation2 + $0x2]]  ;;  %vm244_vm0 = vcmp.lt.s32.totalorder %v2102_v14, 17  ;;  %vm395_vm1 = vcmp.lt.s32.totalorder %v2102_v14, 16  ;;  %vm531_vm2 = vcmp.lt.s32.totalorder %v2102_v14, 15  ;;  %vm667_vm3 = vcmp.lt.s32.totalorder %v2102_v14, 1 }
  0x17   : > { %v1699_v0 = vld [vmem:[%s2043_s28 + $0x1] ss:$4 sm:$0x3]  ;;  %v225_v1 = vld [vmem:[%s2043_s28] ss:$4 sm:$0x3] }
  0x18   : > { %v2047_v2 = vperm.slane %v1699_v0, 0  ;;  %v2049_v3 = vperm.slane %v225_v1, 0  ;;  %v1700_v4 = vld [vmem:[%s2043_s28 + $0x2] ss:$4 sm:$0x3]  ;;  %v2057_v6 = vperm.slane %v1699_v0, 1 }
  0x19   : > { %v2054_v5 = vperm.slane %v1700_v4, 0  ;;  %v2059_v7 = vperm.slane %v225_v1, 1  ;;  %v2061_v8 = vperm.slane %v1700_v4, 1  ;;  %v1701_v9 = vld [vmem:[%s2043_s28 + $0x3] ss:$4 sm:$0x3] }
  0x1a   : > { %283 = vrot.lane.b32.xlu1 %v2047_v2, %s1983_s29  ;;  %238 = vrot.lane.b32.xlu0 %v2049_v3, %s1983_s29  ;;  %v2067_v10 = vperm.slane %v1701_v9, 1  ;;  %v2069_v11 = vperm.slane %v1701_v9, 0  ;;  %s2109_s9 = sld [smem:[#allocation2 + $0x6]]  ;;  %s1988_s17 = smov 113   ;;  %vm963_vm4 = vcmp.lt.s32.totalorder %v2102_v14, 127  ;;  %vm1099_vm5 = vcmp.lt.s32.totalorder %v2102_v14, 113 }
  0x1b   : > { %320 = vrot.lane.b32.xlu2 %v2054_v5, %s1983_s29  ;;  %s2112_s10 = sld [smem:[#allocation2 + $0xa]]  ;;  %vm1235_vm6 = vcmp.lt.s32.totalorder %v2102_v14, 112  ;;  %vm1371_vm7 = vcmp.lt.s32.totalorder %v2102_v14, 111 }
  0x1c   : > { %s2114_s11 = sld [smem:[#allocation2 + $0xe]]  ;;  %v329_v23 = vstv %s2106_s8 }
  0x1d   : > { %s2120_s12 = sld [smem:[#allocation2 + $0x1]] }
  0x1e   : > { %s2122_s13 = sld [smem:[#allocation2 + $0x5]] }
  0x1f   : > { %s2124_s14 = sld [smem:[#allocation2 + $0x9]] }
  0x20   : > { %s2129_s18 = sld [smem:[#allocation2 + $0xd]]  ;;  %v335_v24 = vstv %s2109_s9 }
  0x21   : > { %s2131_s19 = sld [smem:[#allocation2]]  ;;  %v341_v25 = vstv %s2112_s10 }
  0x22   : > { %285 = vrot.lane.b32.xlu1 %v2057_v6, %s1983_s29  ;;  %240 = vrot.lane.b32.xlu0 %v2059_v7, %s1983_s29  ;;  %s2133_s20 = sld [smem:[#allocation2 + $0x4]]  ;;  %v347_v26 = vstv %s2114_s11 }
  0x23   : > { %322 = vrot.lane.b32.xlu2 %v2061_v8, %s1983_s29  ;;  %s2137_s21 = sld [smem:[#allocation2 + $0x8]]  ;;  %v292_v29 = vstv %s2120_s12 }
  0x24   : > { %s2139_s22 = sld [smem:[#allocation2 + $0xc]]  ;;  %v298_v30 = vstv %s2122_s13 }
  0x25   : > { %s2141_s23 = sld [smem:[#allocation2 + $0x3]]  ;;  %v304_v31 = vstv %s2124_s14 }
  0x26   : > { %s2146_s27 = sld [smem:[#allocation2 + $0x7]]  ;;  %v310_v32 = vstv %s2129_s18  ;;  %s1989_s18 = smov 112  }
  0x27   : > { %v255_v33 = vstv %s2131_s19  ;;  %s2211_s10 = sld [smem:[#allocation2 + $0x1c]] }
  0x28   : > { %v261_v34 = vstv %s2133_s20  ;;  %s2225_s11 = sld [smem:[#allocation2 + $0x11]] }
  0x29   : > { %v267_v35 = vstv %s2137_s21  ;;  %s2231_s12 = sld [smem:[#allocation2 + $0x15]] }
  0x2a   : > { %359 = vrot.lane.b32.xlu1 %v2067_v10, %s1983_s29  ;;  %357 = vrot.lane.b32.xlu0 %v2069_v11, %s1983_s29  ;;  %s2148_s29 = sld [smem:[#allocation2 + $0xb]]  ;;  %v273_v36 = vstv %s2139_s22 }
  0x2b   : > { %391 = vrot.lane.b32.xlu2 %v2049_v3, %s1984_s30  ;;  %v366_v37 = vstv %s2141_s23  ;;  %s2239_s13 = sld [smem:[#allocation2 + $0x19]] }
  0x2c   : > { %v372_v38 = vstv %s2146_s27  ;;  %s2241_s14 = sld [smem:[#allocation2 + $0x1d]] }
  0x2d   : > { %s2247_s19 = sld [smem:[#allocation2 + $0x16]] }
  0x2e   : > { %s2258_s20 = sld [smem:[#allocation2 + $0x1a]] }
  0x2f   : > { %s2264_s21 = sld [smem:[#allocation2 + $0x1e]] }
  0x30   : > { %v378_v39 = vstv %s2148_s29  ;;  %s2272_s22 = sld [smem:[#allocation2 + $0x13]] }
  0x31   : > { %s2278_s24 = sld [smem:[#allocation2 + $0x17]] }
  0x32   : > { %429 = vrot.lane.b32.xlu1 %v2047_v2, %s1984_s30  ;;  %393 = vrot.lane.b32.xlu0 %v2059_v7, %s1984_s30  ;;  %s2322_s23 = sld [smem:[#allocation2 + $0x1b]] }
  0x33   : > { %431 = vrot.lane.b32.xlu2 %v2057_v6, %s1984_s30  ;;  %s2330_s26 = sld [smem:[#allocation2 + $0x1f]] }
  0x34   : > { %s2342_s27 = sld [smem:[#allocation2 + $0x20]] }
  0x35   : > { %s2350_s29 = sld [smem:[#allocation2 + $0x24]] }
  0x36   : > { %s2375_s8 = sld [smem:[#allocation2 + $0x2c]] }
  0x37   : > { %s2377_s9 = sld [smem:[#allocation2 + $0x21]] }
  0x3a   : > { %463 = vrot.lane.b32.xlu1 %v2061_v8, %s1984_s30  ;;  %461 = vrot.lane.b32.xlu0 %v2054_v5, %s1984_s30 }
  0x3b   : > { %493 = vrot.lane.b32.xlu2 %v2069_v11, %s1984_s30 }
  0x42   : > { %527 = vrot.lane.b32.xlu1 %v2049_v3, %s1985_s5  ;;  %495 = vrot.lane.b32.xlu0 %v2067_v10, %s1984_s30  ;;  %s2154_s30 = sld [smem:[#allocation2 + $0xf]] }
  0x43   : > { %529 = vrot.lane.b32.xlu2 %v2059_v7, %s1985_s5 }
  0x48   : > { %v384_v40 = vstv %s2154_s30  ;;  %s2352_s30 = sld [smem:[#allocation2 + $0x28]] }
  0x4a   : > { %567 = vrot.lane.b32.xlu1 %v2057_v6, %s1985_s5  ;;  %565 = vrot.lane.b32.xlu0 %v2047_v2, %s1985_s5 }
  0x4b   : > { %597 = vrot.lane.b32.xlu2 %v2054_v5, %s1985_s5 }
  0x52   : > { %629 = vrot.lane.b32.xlu1 %v2069_v11, %s1985_s5  ;;  %599 = vrot.lane.b32.xlu0 %v2061_v8, %s1985_s5 }
  0x53   : > { %631 = vrot.lane.b32.xlu2 %v2067_v10, %s1985_s5  ;;  %s2162_s5 = sld [smem:[#allocation2 + $0x10]] }
  0x59   : > { %v406_v62 = vstv %s2162_s5  ;;  %s1990_s5 = smov 111  }
  0x5a   : > { %665 = vrot.lane.b32.xlu1 %v2059_v7, %s1986_s6  ;;  %663 = vrot.lane.b32.xlu0 %v2049_v3, %s1986_s6 }
  0x5b   : > { %701 = vrot.lane.b32.xlu2 %v2047_v2, %s1986_s6 }
  0x62   : > { %733 = vrot.lane.b32.xlu1 %v2054_v5, %s1986_s6  ;;  %703 = vrot.lane.b32.xlu0 %v2057_v6, %s1986_s6 }
  0x63   : > { %735 = vrot.lane.b32.xlu2 %v2061_v8, %s1986_s6 }
  0x6a   : > { %767 = vrot.lane.b32.xlu1 %v2067_v10, %s1986_s6  ;;  %765 = vrot.lane.b32.xlu0 %v2069_v11, %s1986_s6  ;;  %s2168_s6 = sld [smem:[#allocation2 + $0x14]] }
  0x6b   : > { %959 = vrot.lane.b32.xlu2 %v2049_v3, %s1987_s7 }
  0x70   : > { %v412_v63 = vstv %s2168_s6  ;;  %s2526_s6 = sld [smem:[#allocation2 + $0x35]] }
  0x72   : > { %997 = vrot.lane.b32.xlu1 %v2047_v2, %s1987_s7  ;;  %961 = vrot.lane.b32.xlu0 %v2059_v7, %s1987_s7 }
  0x73   : > { %999 = vrot.lane.b32.xlu2 %v2057_v6, %s1987_s7 }
  0x75   : > { %v321_v13 = vpop.permute.xlu2 %320 }
  0x7a   : > { %1031 = vrot.lane.b32.xlu1 %v2061_v8, %s1987_s7  ;;  %1029 = vrot.lane.b32.xlu0 %v2054_v5, %s1987_s7 }
  0x7b   : > { %1061 = vrot.lane.b32.xlu2 %v2069_v11, %s1987_s7 }
  0x7d   : > { %v323_v15 = vpop.permute.xlu2 %322 }
  0x7e   : > { %v324_v16 = vsel %vm244_vm0, %v321_v13, %v323_v15  ;;  %v325_v17 = vsel %vm244_vm0, %v323_v15, %v321_v13 }
  0x7f   : > { %v326_v27 = vmul.f32 %v325_v17, %v2156_v19  ;;  %v327_v28 = vmul.f32 %v324_v16, %v2158_v20 }
  0x81   : > { %v2190_v41 = vmul.f32 %v329_v23, %v326_v27  ;;  %v2192_v42 = vmul.f32 %v329_v23, %v327_v28  ;;  %v2194_v43 = vmul.f32 %v335_v24, %v326_v27  ;;  %v2196_v44 = vmul.f32 %v335_v24, %v327_v28 }
  0x82   : > { %1095 = vrot.lane.b32.xlu1 %v2049_v3, %s1988_s17  ;;  %1063 = vrot.lane.b32.xlu0 %v2067_v10, %s1987_s7  ;;  %s2174_s7 = sld [smem:[#allocation2 + $0x18]]  ;;  %v2198_v45 = vmul.f32 %v341_v25, %v326_v27  ;;  %v2200_v46 = vmul.f32 %v341_v25, %v327_v28  ;;  %v2202_v47 = vmul.f32 %v347_v26, %v326_v27 }
  0x83   : > { %1097 = vrot.lane.b32.xlu2 %v2059_v7, %s1988_s17  ;;  %v2204_v48 = vmul.f32 %v347_v26, %v327_v28 }
  0x85   : > { %v2223_v56 = vpop.permute.xlu2 %391 }
  0x88   : > { %v418_v0 = vstv %s2174_s7  ;;  %s2528_s7 = sld [smem:[#allocation2 + $0x39]] }
  0x8a   : > { %1135 = vrot.lane.b32.xlu1 %v2057_v6, %s1988_s17  ;;  %1133 = vrot.lane.b32.xlu0 %v2047_v2, %s1988_s17 }
  0x8b   : > { %1165 = vrot.lane.b32.xlu2 %v2054_v5, %s1988_s17 }
  0x8c   : > { %v284_v21 = vpop.permute.xlu1 %283  ;;  %v239_v22 = vpop.permute.xlu0 %238 }
  0x92   : > { %1197 = vrot.lane.b32.xlu1 %v2069_v11, %s1988_s17  ;;  %1167 = vrot.lane.b32.xlu0 %v2061_v8, %s1988_s17 }
  0x93   : > { %1199 = vrot.lane.b32.xlu2 %v2067_v10, %s1988_s17  ;;  %s2243_s17 = sld [smem:[#allocation2 + $0x12]] }
  0x94   : > { %v286_v49 = vpop.permute.xlu1 %285  ;;  %v241_v50 = vpop.permute.xlu0 %240 }
  0x95   : > { %v287_v52 = vsel %vm244_vm0, %v284_v21, %v286_v49  ;;  %v288_v53 = vsel %vm244_vm0, %v286_v49, %v284_v21  ;;  %v245_v54 = vsel %vm244_vm0, %v239_v22, %v241_v50  ;;  %v246_v55 = vsel %vm244_vm0, %v241_v50, %v239_v22 }
  0x96   : > { %v289_v57 = vmul.f32 %v288_v53, %v2156_v19  ;;  %v290_v58 = vmul.f32 %v287_v52, %v2158_v20  ;;  %v252_v59 = vmul.f32 %v2156_v19, %v246_v55  ;;  %v253_v60 = vmul.f32 %v2158_v20, %v245_v54 }
  0x98   : > { %v293_v1 = vmul.f32 %v292_v29, %v289_v57  ;;  %v294_v4 = vmul.f32 %v292_v29, %v290_v58  ;;  %v299_v9 = vmul.f32 %v298_v30, %v289_v57  ;;  %v300_v13 = vmul.f32 %v298_v30, %v290_v58 }
  0x99   : > { %v305_v15 = vmul.f32 %v304_v31, %v289_v57  ;;  %v306_v16 = vmul.f32 %v304_v31, %v290_v58  ;;  %v311_v17 = vmul.f32 %v310_v32, %v289_v57  ;;  %v312_v18 = vmul.f32 %v310_v32, %v290_v58 }
  0x9a   : > { %v256_v21 = vmul.f32 %v255_v33, %v252_v59  ;;  %v257_v22 = vmul.f32 %v255_v33, %v253_v60  ;;  %v262_v23 = vmul.f32 %v261_v34, %v252_v59  ;;  %v263_v24 = vmul.f32 %v261_v34, %v253_v60  ;;  %1233 = vrot.lane.b32.xlu1 %v2059_v7, %s1989_s18 }
  0x9b   : > { %v268_v25 = vmul.f32 %v267_v35, %v252_v59  ;;  %v269_v26 = vmul.f32 %v267_v35, %v253_v60  ;;  %v274_v27 = vmul.f32 %v273_v36, %v252_v59  ;;  %v275_v28 = vmul.f32 %v273_v36, %v253_v60  ;;  %1231 = vrot.lane.b32.xlu0 %v2049_v3, %s1989_s18 }
  0x9c   : > { %v295_v29 = vadd.f32 %v293_v1, %v256_v21  ;;  %v296_v30 = vadd.f32 %v294_v4, %v257_v22  ;;  %v301_v31 = vadd.f32 %v299_v9, %v262_v23  ;;  %v302_v32 = vadd.f32 %v300_v13, %v263_v24  ;;  %v360_v33 = vpop.permute.xlu1 %359  ;;  %v358_v49 = vpop.permute.xlu0 %357  ;;  %1269 = vrot.lane.b32.xlu2 %v2047_v2, %s1989_s18 }
  0x9d   : > { %v307_v34 = vadd.f32 %v305_v15, %v268_v25  ;;  %v308_v50 = vadd.f32 %v306_v16, %v269_v26  ;;  %v313_v35 = vadd.f32 %v311_v17, %v274_v27  ;;  %v314_v36 = vadd.f32 %v312_v18, %v275_v28 }
  0x9e   : > { %v332_v52 = vadd.f32 %v2190_v41, %v295_v29  ;;  %v333_v53 = vadd.f32 %v2192_v42, %v296_v30  ;;  %v338_v54 = vadd.f32 %v2194_v43, %v301_v31  ;;  %v339_v55 = vadd.f32 %v2196_v44, %v302_v32  ;;  %v432_v41 = vpop.permute.xlu2 %431 }
  0x9f   : > { %v344_v57 = vadd.f32 %v2198_v45, %v307_v34  ;;  %v345_v58 = vadd.f32 %v2200_v46, %v308_v50  ;;  %v350_v59 = vadd.f32 %v2202_v47, %v313_v35  ;;  %v351_v60 = vadd.f32 %v2204_v48, %v314_v36 }
  0xa0   : > { %v361_v42 = vsel %vm244_vm0, %v358_v49, %v360_v33  ;;  %v362_v43 = vsel %vm244_vm0, %v360_v33, %v358_v49  ;;  %v424_v44 = vstv %s2211_s10  ;;  %v438_v45 = vstv %s2225_s11  ;;  %s2387_s10 = sld [smem:[#allocation2 + $0x25]] }
  0xa1   : > { %v363_v46 = vmul.f32 %v362_v43, %v2156_v19  ;;  %v364_v47 = vmul.f32 %v361_v42, %v2158_v20  ;;  %v444_v48 = vstv %s2231_s12  ;;  %v450_v1 = vstv %s2239_s13  ;;  %s2396_s11 = sld [smem:[#allocation2 + $0x29]] }
  0xa2   : > { %1301 = vrot.lane.b32.xlu1 %v2054_v5, %s1989_s18  ;;  %v2283_v4 = vperm.slane %v2209_v51, 1  ;;  %v456_v9 = vstv %s2241_s14  ;;  %v470_v13 = vstv %s2243_s17  ;;  %v476_v15 = vstv %s2247_s19  ;;  %s2437_s12 = sld [smem:[#allocation2 + $0x2d]] }
  0xa3   : > { %v367_v19 = vmul.f32 %v366_v37, %v363_v46  ;;  %v368_v16 = vmul.f32 %v366_v37, %v364_v47  ;;  %v373_v20 = vmul.f32 %v372_v38, %v363_v46  ;;  %v374_v17 = vmul.f32 %v372_v38, %v364_v47  ;;  %1271 = vrot.lane.b32.xlu0 %v2057_v6, %s1989_s18  ;;  %s2445_s13 = sld [smem:[#allocation2 + $0x22]] }
  0xa4   : > { %v379_v18 = vmul.f32 %v378_v39, %v363_v46  ;;  %v380_v21 = vmul.f32 %v378_v39, %v364_v47  ;;  %v385_v51 = vmul.f32 %v384_v40, %v363_v46  ;;  %v386_v22 = vmul.f32 %v384_v40, %v364_v47  ;;  %v430_v23 = vpop.permute.xlu1 %429  ;;  %v394_v24 = vpop.permute.xlu0 %393  ;;  %1303 = vrot.lane.b32.xlu2 %v2061_v8, %s1989_s18  ;;  %s2455_s14 = sld [smem:[#allocation2 + $0x26]] }
  0xa5   : > { %v369_v37 = vadd.f32 %v367_v19, %v332_v52  ;;  %v370_v38 = vadd.f32 %v368_v16, %v333_v53  ;;  %v375_v25 = vadd.f32 %v373_v20, %v338_v54  ;;  %v376_v26 = vadd.f32 %v374_v17, %v339_v55  ;;  %s2457_s17 = sld [smem:[#allocation2 + $0x2a]] }
  0xa6   : > { %v381_v27 = vadd.f32 %v379_v18, %v344_v57  ;;  %v382_v28 = vadd.f32 %v380_v21, %v345_v58  ;;  %v387_v39 = vadd.f32 %v385_v51, %v350_v59  ;;  %v388_v29 = vadd.f32 %v386_v22, %v351_v60  ;;  %v2326_v36 = vpop.permute.xlu2 %493  ;;  %s2485_s19 = sld [smem:[#allocation2 + $0x23]] }
  0xa7   : > { %v396_v40 = vsel %vm395_vm1, %v2223_v56, %v394_v24  ;;  %v397_v30 = vsel %vm395_vm1, %v394_v24, %v2223_v56  ;;  %v433_v31 = vsel %vm395_vm1, %v430_v23, %v432_v41  ;;  %v434_v32 = vsel %vm395_vm1, %v432_v41, %v430_v23 }
  0xa8   : > { %v403_v33 = vmul.f32 %v2234_v61, %v397_v30  ;;  %v404_v49 = vmul.f32 %v2283_v4, %v396_v40  ;;  %v482_v34 = vstv %s2258_s20  ;;  %v488_v50 = vstv %s2264_s21  ;;  %s2487_s20 = sld [smem:[#allocation2 + $0x27]] }
  0xa9   : > { %v435_v56 = vmul.f32 %v434_v32, %v2234_v61  ;;  %v436_v35 = vmul.f32 %v433_v31, %v2283_v4  ;;  %v502_v52 = vstv %s2272_s22  ;;  %v508_v53 = vstv %s2278_s24  ;;  %s2489_s21 = sld [smem:[#allocation2 + $0x2b]] }
  0xaa   : > { %v407_v54 = vmul.f32 %v406_v62, %v403_v33  ;;  %v408_v55 = vmul.f32 %v406_v62, %v404_v49  ;;  %v413_v57 = vmul.f32 %v412_v63, %v403_v33  ;;  %v414_v58 = vmul.f32 %v412_v63, %v404_v49  ;;  %1335 = vrot.lane.b32.xlu1 %v2067_v10, %s1989_s18  ;;  %s2491_s22 = sld [smem:[#allocation2 + $0x2f]] }
  0xab   : > { %v419_v59 = vmul.f32 %v418_v0, %v403_v33  ;;  %v420_v60 = vmul.f32 %v418_v0, %v404_v49  ;;  %v425_v41 = vmul.f32 %v424_v44, %v403_v33  ;;  %v426_v42 = vmul.f32 %v424_v44, %v404_v49  ;;  %1333 = vrot.lane.b32.xlu0 %v2069_v11, %s1989_s18  ;;  %s2461_s18 = sld [smem:[#allocation2 + $0x2e]] }
  0xac   : > { %v409_v62 = vadd.f32 %v407_v54, %v369_v37  ;;  %v410_v63 = vadd.f32 %v408_v55, %v370_v38  ;;  %v415_v43 = vadd.f32 %v413_v57, %v375_v25  ;;  %v416_v46 = vadd.f32 %v414_v58, %v376_v26  ;;  %v464_v47 = vpop.permute.xlu1 %463  ;;  %v462_v0 = vpop.permute.xlu0 %461  ;;  %1367 = vrot.lane.b32.xlu2 %v2049_v3, %s1990_s5  ;;  %s2496_s24 = sld [smem:[#allocation2 + $0x30]] }
  0xad   : > { %v421_v44 = vadd.f32 %v419_v59, %v381_v27  ;;  %v422_v19 = vadd.f32 %v420_v60, %v382_v28  ;;  %v427_v16 = vadd.f32 %v425_v41, %v387_v39  ;;  %v428_v20 = vadd.f32 %v426_v42, %v388_v29 }
  0xae   : > { %v439_v17 = vmul.f32 %v438_v45, %v435_v56  ;;  %v440_v18 = vmul.f32 %v438_v45, %v436_v35  ;;  %v445_v21 = vmul.f32 %v444_v48, %v435_v56  ;;  %v446_v51 = vmul.f32 %v444_v48, %v436_v35  ;;  %v1734_v45 = vld [vmem:[%s3062_s1 + $0x2] ss:$8 sm:$0x3]  ;;  %v530_v32 = vpop.permute.xlu2 %529 }
  0xaf   : > { %v451_v22 = vmul.f32 %v450_v1, %v435_v56  ;;  %v452_v23 = vmul.f32 %v450_v1, %v436_v35  ;;  %v457_v24 = vmul.f32 %v456_v9, %v435_v56  ;;  %v458_v3 = vmul.f32 %v456_v9, %v436_v35 }
  0xb0   : > { %v441_v37 = vadd.f32 %v439_v17, %v409_v62  ;;  %v442_v38 = vadd.f32 %v440_v18, %v410_v63  ;;  %v447_v25 = vadd.f32 %v445_v21, %v415_v43  ;;  %v448_v26 = vadd.f32 %v446_v51, %v416_v46 }
  0xb1   : > { %v453_v48 = vadd.f32 %v451_v22, %v421_v44  ;;  %v454_v27 = vadd.f32 %v452_v23, %v422_v19  ;;  %v459_v28 = vadd.f32 %v457_v24, %v427_v16  ;;  %v460_v1 = vadd.f32 %v458_v3, %v428_v20 }
  0xb2   : > { %v465_v9 = vsel %vm395_vm1, %v462_v0, %v464_v47  ;;  %v466_v39 = vsel %vm395_vm1, %v464_v47, %v462_v0  ;;  %1405 = vrot.lane.b32.xlu1 %v2047_v2, %s1990_s5  ;;  %v514_v29 = vstv %s2322_s23  ;;  %v520_v40 = vstv %s2330_s26  ;;  %s2500_s23 = sld [smem:[#allocation2 + $0x34]] }
  0xb3   : > { %v467_v30 = vmul.f32 %v466_v39, %v2234_v61  ;;  %v468_v31 = vmul.f32 %v465_v9, %v2283_v4  ;;  %1369 = vrot.lane.b32.xlu0 %v2059_v7, %s1990_s5  ;;  %v2394_v2 = vperm.slane %v1734_v45, 0  ;;  %v2398_v56 = vperm.slane %v1734_v45, 1  ;;  %s2592_s26 = sld [smem:[#allocation2 + $0x49]] }
  0xb4   : > { %v528_v33 = vpop.permute.xlu1 %527  ;;  %v496_v49 = vpop.permute.xlu0 %495  ;;  %v542_v35 = vstv %s2342_s27  ;;  %v548_v54 = vstv %s2350_s29  ;;  %v554_v55 = vstv %s2352_s30  ;;  %1407 = vrot.lane.b32.xlu2 %v2057_v6, %s1990_s5  ;;  %s2505_s29 = sld [smem:[#allocation2 + $0x38]] }
  0xb5   : > { %v471_v7 = vmul.f32 %v470_v13, %v467_v30  ;;  %v472_v57 = vmul.f32 %v470_v13, %v468_v31  ;;  %v477_v58 = vmul.f32 %v476_v15, %v467_v30  ;;  %v478_v59 = vmul.f32 %v476_v15, %v468_v31  ;;  %s2509_s30 = sld [smem:[#allocation2 + $0x3c]] }
  0xb6   : > { %v483_v60 = vmul.f32 %v482_v34, %v467_v30  ;;  %v484_v41 = vmul.f32 %v482_v34, %v468_v31  ;;  %v489_v42 = vmul.f32 %v488_v50, %v467_v30  ;;  %v490_v62 = vmul.f32 %v488_v50, %v468_v31  ;;  %s2598_s27 = sld [smem:[#allocation2 + $0x4d]] }
  0xb7   : > { %v473_v63 = vadd.f32 %v471_v7, %v441_v37  ;;  %v474_v43 = vadd.f32 %v472_v57, %v442_v38  ;;  %v479_v13 = vadd.f32 %v477_v58, %v447_v25  ;;  %v480_v46 = vadd.f32 %v478_v59, %v448_v26 }
  0xb8   : > { %v485_v47 = vadd.f32 %v483_v60, %v453_v48  ;;  %v486_v0 = vadd.f32 %v484_v41, %v454_v27  ;;  %v491_v15 = vadd.f32 %v489_v42, %v459_v28  ;;  %v492_v6 = vadd.f32 %v490_v62, %v460_v1  ;;  %v598_v27 = vpop.permute.xlu2 %597 }
  0xb9   : > { %v497_v34 = vsel %vm395_vm1, %v2326_v36, %v496_v49  ;;  %v498_v50 = vsel %vm395_vm1, %v496_v49, %v2326_v36  ;;  %v532_v44 = vsel %vm531_vm2, %v528_v33, %v530_v32  ;;  %v533_v19 = vsel %vm531_vm2, %v530_v32, %v528_v33 }
  0xba   : > { %v499_v16 = vmul.f32 %v498_v50, %v2234_v61  ;;  %v500_v20 = vmul.f32 %v497_v34, %v2283_v4  ;;  %v560_v17 = vstv %s2375_s8  ;;  %1439 = vrot.lane.b32.xlu1 %v2061_v8, %s1990_s5  ;;  %v574_v18 = vstv %s2377_s9  ;;  %s2531_s8 = sld [smem:[#allocation2 + $0x3d]] }
  0xbb   : > { %v539_v36 = vmul.f32 %v2394_v2, %v533_v19  ;;  %v540_v21 = vmul.f32 %v2398_v56, %v532_v44  ;;  %1437 = vrot.lane.b32.xlu0 %v2054_v5, %s1990_s5  ;;  %v580_v51 = vstv %s2387_s10  ;;  %v586_v22 = vstv %s2396_s11  ;;  %s2538_s9 = sld [smem:[#allocation2 + $0x32]] }
  0xbc   : > { %v503_v61 = vmul.f32 %v502_v52, %v499_v16  ;;  %v504_v4 = vmul.f32 %v502_v52, %v500_v20  ;;  %v509_v8 = vmul.f32 %v508_v53, %v499_v16  ;;  %v510_v23 = vmul.f32 %v508_v53, %v500_v20  ;;  %v568_v24 = vpop.permute.xlu1 %567  ;;  %v566_v3 = vpop.permute.xlu0 %565  ;;  %1469 = vrot.lane.b32.xlu2 %v2069_v11, %s1990_s5  ;;  %s2542_s10 = sld [smem:[#allocation2 + $0x36]] }
  0xbd   : > { %v515_v37 = vmul.f32 %v514_v29, %v499_v16  ;;  %v516_v38 = vmul.f32 %v514_v29, %v500_v20  ;;  %v521_v25 = vmul.f32 %v520_v40, %v499_v16  ;;  %v522_v5 = vmul.f32 %v520_v40, %v500_v20  ;;  %s2546_s11 = sld [smem:[#allocation2 + $0x3a]] }
  0xbe   : > { %v505_v26 = vadd.f32 %v503_v61, %v473_v63  ;;  %v506_v45 = vadd.f32 %v504_v4, %v474_v43  ;;  %v511_v52 = vadd.f32 %v509_v8, %v479_v13  ;;  %v512_v48 = vadd.f32 %v510_v23, %v480_v46 }
  0xbf   : > { %v517_v53 = vadd.f32 %v515_v37, %v485_v47  ;;  %v518_v28 = vadd.f32 %v516_v38, %v486_v0  ;;  %v523_v1 = vadd.f32 %v521_v25, %v491_v15  ;;  %v524_v9 = vadd.f32 %v522_v5, %v492_v6 }
  0xc0   : > { %v543_v39 = vmul.f32 %v542_v35, %v539_v36  ;;  %v544_v29 = vmul.f32 %v542_v35, %v540_v21  ;;  %v549_v40 = vmul.f32 %v548_v54, %v539_v36  ;;  %v550_v30 = vmul.f32 %v548_v54, %v540_v21  ;;  %v632_v61 = vpop.permute.xlu2 %631 }
  0xc1   : > { %v555_v31 = vmul.f32 %v554_v55, %v539_v36  ;;  %v556_v32 = vmul.f32 %v554_v55, %v540_v21  ;;  %v561_v11 = vmul.f32 %v560_v17, %v539_v36  ;;  %v562_v33 = vmul.f32 %v560_v17, %v540_v21 }
  0xc2   : > { %v545_v49 = vadd.f32 %v543_v39, %v505_v26  ;;  %v546_v7 = vadd.f32 %v544_v29, %v506_v45  ;;  %v551_v57 = vadd.f32 %v549_v40, %v511_v52  ;;  %v552_v58 = vadd.f32 %v550_v30, %v512_v48 }
  0xc3   : > { %v557_v59 = vadd.f32 %v555_v31, %v517_v53  ;;  %v558_v60 = vadd.f32 %v556_v32, %v518_v28  ;;  %v563_v41 = vadd.f32 %v561_v11, %v523_v1  ;;  %v564_v42 = vadd.f32 %v562_v33, %v524_v9  ;;  %1471 = vrot.lane.b32.xlu0 %v2067_v10, %s1990_s5  ;;  %v1751_v9 = vld [vmem:[%s3062_s1 + $0x3] ss:$8 sm:$0x3]  ;;  %s2522_s5 = sld [smem:[#allocation2 + $0x31]] }
  0xc4   : > { %v592_v35 = vstv %s2437_s12  ;;  %v569_v54 = vsel %vm531_vm2, %v566_v3, %v568_v24  ;;  %v570_v55 = vsel %vm531_vm2, %v568_v24, %v566_v3  ;;  %v606_v62 = vstv %s2445_s13  ;;  %v600_v63 = vpop.permute.xlu0 %599  ;;  %v630_v0 = vpop.permute.xlu1 %629  ;;  %s2548_s12 = sld [smem:[#allocation2 + $0x3e]] }
  0xc5   : > { %v571_v43 = vmul.f32 %v570_v55, %v2394_v2  ;;  %v572_v13 = vmul.f32 %v569_v54, %v2398_v56  ;;  %v612_v46 = vstv %s2455_s14  ;;  %v602_v47 = vsel %vm531_vm2, %v600_v63, %v598_v27  ;;  %s2551_s13 = sld [smem:[#allocation2 + $0x33]] }
  0xc6   : > { %v618_v10 = vstv %s2457_s17  ;;  %v624_v15 = vstv %s2461_s18  ;;  %v601_v6 = vsel %vm531_vm2, %v598_v27, %v600_v63  ;;  %v603_v34 = vmul.f32 %v602_v47, %v2394_v2  ;;  %s2557_s14 = sld [smem:[#allocation2 + $0x37]] }
  0xc7   : > { %v575_v50 = vmul.f32 %v574_v18, %v571_v43  ;;  %v576_v44 = vmul.f32 %v574_v18, %v572_v13  ;;  %v581_v19 = vmul.f32 %v580_v51, %v571_v43  ;;  %v582_v16 = vmul.f32 %v580_v51, %v572_v13  ;;  %s2560_s17 = sld [smem:[#allocation2 + $0x3b]] }
  0xc8   : > { %v587_v20 = vmul.f32 %v586_v22, %v571_v43  ;;  %v588_v17 = vmul.f32 %v586_v22, %v572_v13  ;;  %v593_v36 = vmul.f32 %v592_v35, %v571_v43  ;;  %v594_v21 = vmul.f32 %v592_v35, %v572_v13  ;;  %s2564_s18 = sld [smem:[#allocation2 + $0x40]] }
  0xc9   : > { %v577_v4 = vadd.f32 %v575_v50, %v545_v49  ;;  %v578_v8 = vadd.f32 %v576_v44, %v546_v7  ;;  %v583_v23 = vadd.f32 %v581_v19, %v551_v57  ;;  %v584_v24 = vadd.f32 %v582_v16, %v552_v58  ;;  %v702_v57 = vpop.permute.xlu2 %701 }
  0xca   : > { %v589_v3 = vadd.f32 %v587_v20, %v557_v59  ;;  %v590_v37 = vadd.f32 %v588_v17, %v558_v60  ;;  %v595_v38 = vadd.f32 %v593_v36, %v563_v41  ;;  %v596_v25 = vadd.f32 %v594_v21, %v564_v42 }
  0xcb   : > { %v607_v18 = vmul.f32 %v606_v62, %v603_v34  ;;  %v613_v51 = vmul.f32 %v612_v46, %v603_v34  ;;  %v604_v22 = vmul.f32 %v601_v6, %v2398_v56  ;;  %v619_v5 = vmul.f32 %v618_v10, %v603_v34 }
  0xcc   : > { %v625_v26 = vmul.f32 %v624_v15, %v603_v34  ;;  %v664_v45 = vpop.permute.xlu0 %663  ;;  %v634_v27 = vsel %vm531_vm2, %v632_v61, %v630_v0  ;;  %v633_v1 = vsel %vm531_vm2, %v630_v0, %v632_v61  ;;  %v666_v30 = vpop.permute.xlu1 %665  ;;  %v638_v32 = vstv %s2485_s19  ;;  %s2568_s19 = sld [smem:[#allocation2 + $0x44]] }
  0xcd   : > { %v609_v52 = vadd.f32 %v607_v18, %v577_v4  ;;  %v615_v48 = vadd.f32 %v613_v51, %v583_v23  ;;  %v621_v53 = vadd.f32 %v619_v5, %v589_v3  ;;  %v608_v39 = vmul.f32 %v606_v62, %v604_v22 }
  0xce   : > { %v627_v28 = vadd.f32 %v625_v26, %v595_v38  ;;  %v614_v29 = vmul.f32 %v612_v46, %v604_v22  ;;  %v635_v40 = vmul.f32 %v634_v27, %v2394_v2  ;;  %v620_v31 = vmul.f32 %v618_v10, %v604_v22 }
  0xcf   : > { %v636_v11 = vmul.f32 %v633_v1, %v2398_v56  ;;  %v626_v33 = vmul.f32 %v624_v15, %v604_v22  ;;  %v644_v49 = vstv %s2487_s20  ;;  %v2514_v7 = vperm.slane %v1751_v9, 0  ;;  %s2570_s20 = sld [smem:[#allocation2 + $0x48]] }
  0xd0   : > { %v650_v58 = vstv %s2489_s21  ;;  %v656_v59 = vstv %s2491_s22  ;;  %v2518_v60 = vperm.slane %v1751_v9, 1  ;;  %v669_v2 = vsel %vm667_vm3, %v666_v30, %v664_v45  ;;  %s2573_s21 = sld [smem:[#allocation2 + $0x3f]] }
  0xd1   : > { %v610_v41 = vadd.f32 %v608_v39, %v578_v8  ;;  %v616_v42 = vadd.f32 %v614_v29, %v584_v24  ;;  %v639_v35 = vmul.f32 %v638_v32, %v635_v40  ;;  %v668_v56 = vsel %vm667_vm3, %v664_v45, %v666_v30  ;;  %v736_v5 = vpop.permute.xlu2 %735  ;;  %s2577_s22 = sld [smem:[#allocation2 + $0x4c]] }
  0xd2   : > { %v622_v54 = vadd.f32 %v620_v31, %v590_v37  ;;  %v640_v55 = vmul.f32 %v638_v32, %v636_v11  ;;  %v645_v62 = vmul.f32 %v644_v49, %v635_v40  ;;  %v646_v63 = vmul.f32 %v644_v49, %v636_v11 }
  0xd3   : > { %v628_v43 = vadd.f32 %v626_v33, %v596_v25  ;;  %v651_v13 = vmul.f32 %v650_v58, %v635_v40  ;;  %v652_v46 = vmul.f32 %v650_v58, %v636_v11  ;;  %v675_v47 = vmul.f32 %v2514_v7, %v669_v2 }
  0xd4   : > { %v704_v0 = vpop.permute.xlu0 %703  ;;  %v657_v10 = vmul.f32 %v656_v59, %v635_v40  ;;  %v678_v15 = vstv %s2496_s24  ;;  %v684_v6 = vstv %s2500_s23  ;;  %v676_v34 = vmul.f32 %v2518_v60, %v668_v56  ;;  %v734_v1 = vpop.permute.xlu1 %733  ;;  %s2582_s24 = sld [smem:[#allocation2 + $0x41]] }
  0xd5   : > { %v641_v50 = vadd.f32 %v639_v35, %v609_v52  ;;  %v658_v44 = vmul.f32 %v656_v59, %v636_v11  ;;  %v690_v19 = vstv %s2505_s29  ;;  %v696_v16 = vstv %s2509_s30  ;;  %s2584_s23 = sld [smem:[#allocation2 + $0x45]] }
  0xd6   : > { %v642_v20 = vadd.f32 %v640_v55, %v610_v41  ;;  %v647_v17 = vadd.f32 %v645_v62, %v615_v48  ;;  %v648_v36 = vadd.f32 %v646_v63, %v616_v42  ;;  %v706_v21 = vsel %vm667_vm3, %v704_v0, %v702_v57  ;;  %s2614_s29 = sld [smem:[#allocation2 + $0x42]] }
  0xd7   : > { %v653_v61 = vadd.f32 %v651_v13, %v621_v53  ;;  %v654_v4 = vadd.f32 %v652_v46, %v622_v54  ;;  %v679_v8 = vmul.f32 %v678_v15, %v675_v47  ;;  %v705_v23 = vsel %vm667_vm3, %v702_v57, %v704_v0  ;;  %s2620_s30 = sld [smem:[#allocation2 + $0x46]] }
  0xd8   : > { %v659_v24 = vadd.f32 %v657_v10, %v627_v28  ;;  %v680_v3 = vmul.f32 %v678_v15, %v676_v34  ;;  %v685_v37 = vmul.f32 %v684_v6, %v675_v47  ;;  %v686_v38 = vmul.f32 %v684_v6, %v676_v34 }
  0xd9   : > { %v660_v25 = vadd.f32 %v658_v44, %v628_v43  ;;  %v691_v18 = vmul.f32 %v690_v19, %v675_v47  ;;  %v692_v51 = vmul.f32 %v690_v19, %v676_v34  ;;  %v707_v22 = vmul.f32 %v706_v21, %v2514_v7 }
  0xda   : > { %v710_v26 = vstv %s2522_s5  ;;  %v716_v45 = vstv %s2526_s6  ;;  %v722_v52 = vstv %s2528_s7  ;;  %v708_v48 = vmul.f32 %v705_v23, %v2518_v60  ;;  %s2627_s5 = sld [smem:[#allocation2 + $0x4a]] }
  0xdb   : > { %v681_v27 = vadd.f32 %v679_v8, %v641_v50  ;;  %v697_v53 = vmul.f32 %v696_v16, %v675_v47  ;;  %v698_v28 = vmul.f32 %v696_v16, %v676_v34  ;;  %v728_v9 = vstv %s2531_s8  ;;  %s2632_s6 = sld [smem:[#allocation2 + $0x4e]] }
  0xdc   : > { %v682_v39 = vadd.f32 %v680_v3, %v642_v20  ;;  %v687_v29 = vadd.f32 %v685_v37, %v647_v17  ;;  %v688_v40 = vadd.f32 %v686_v38, %v648_v36  ;;  %v738_v30 = vsel %vm667_vm3, %v736_v5, %v734_v1  ;;  %v768_v3 = vpop.permute.xlu1 %767  ;;  %v766_v38 = vpop.permute.xlu0 %765  ;;  %s2634_s7 = sld [smem:[#allocation2 + $0x43]] }
  0xdd   : > { %v693_v31 = vadd.f32 %v691_v18, %v653_v61  ;;  %v694_v32 = vadd.f32 %v692_v51, %v654_v4  ;;  %v711_v11 = vmul.f32 %v710_v26, %v707_v22  ;;  %v737_v33 = vsel %vm667_vm3, %v734_v1, %v736_v5  ;;  %s2636_s8 = sld [smem:[#allocation2 + $0x47]] }
  0xde   : > { %v712_v49 = vmul.f32 %v710_v26, %v708_v48  ;;  %v717_v57 = vmul.f32 %v716_v45, %v707_v22  ;;  %v718_v58 = vmul.f32 %v716_v45, %v708_v48  ;;  %v723_v59 = vmul.f32 %v722_v52, %v707_v22 }
  0xdf   : > { %v724_v2 = vmul.f32 %v722_v52, %v708_v48  ;;  %v729_v41 = vmul.f32 %v728_v9, %v707_v22  ;;  %v730_v42 = vmul.f32 %v728_v9, %v708_v48  ;;  %v739_v35 = vmul.f32 %v738_v30, %v2514_v7  ;;  %v1927_v22 = vld [vmem:[%s2043_s28] ss:$4 sm:$0x3] }
  0xe0   : > { %v699_v56 = vadd.f32 %v697_v53, %v659_v24  ;;  %v700_v54 = vadd.f32 %v698_v28, %v660_v25  ;;  %v742_v55 = vstv %s2538_s9  ;;  %v740_v62 = vmul.f32 %v737_v33, %v2518_v60  ;;  %s2640_s9 = sld [smem:[#allocation2 + $0x4b]] }
  0xe1   : > { %v713_v63 = vadd.f32 %v711_v11, %v681_v27  ;;  %v748_v43 = vstv %s2542_s10  ;;  %v754_v13 = vstv %s2546_s11  ;;  %v760_v46 = vstv %s2548_s12  ;;  %s2644_s10 = sld [smem:[#allocation2 + $0x4f]] }
  0xe2   : > { %v714_v47 = vadd.f32 %v712_v49, %v682_v39  ;;  %v719_v0 = vadd.f32 %v717_v57, %v687_v29  ;;  %v720_v10 = vadd.f32 %v718_v58, %v688_v40  ;;  %v725_v15 = vadd.f32 %v723_v59, %v693_v31  ;;  %s2653_s11 = sld [smem:[#allocation2 + $0x50]] }
  0xe3   : > { %v726_v6 = vadd.f32 %v724_v2, %v694_v32  ;;  %v731_v34 = vadd.f32 %v729_v41, %v699_v56  ;;  %v732_v50 = vadd.f32 %v730_v42, %v700_v54  ;;  %v743_v44 = vmul.f32 %v742_v55, %v739_v35  ;;  %v1928_v42 = vld [vmem:[%s2043_s28 + $0x1] ss:$4 sm:$0x3]  ;;  %s2655_s12 = sld [smem:[#allocation2 + $0x54]] }
  0xe4   : > { %v744_v19 = vmul.f32 %v742_v55, %v740_v62  ;;  %v749_v16 = vmul.f32 %v748_v43, %v739_v35  ;;  %v774_v20 = vstv %s2551_s13  ;;  %v798_v17 = vstv %s2564_s18  ;;  %s2658_s13 = sld [smem:[#allocation2 + $0x58]] }
  0xe5   : > { %v750_v36 = vmul.f32 %v748_v43, %v740_v62  ;;  %v780_v21 = vstv %s2557_s14  ;;  %v786_v61 = vstv %s2560_s17  ;;  %v808_v4 = vstv %s2568_s19  ;;  %s2662_s14 = sld [smem:[#allocation2 + $0x5c]] }
  0xe6   : > { %v755_v8 = vmul.f32 %v754_v13, %v739_v35  ;;  %v756_v23 = vmul.f32 %v754_v13, %v740_v62  ;;  %v761_v24 = vmul.f32 %v760_v46, %v739_v35  ;;  %v818_v37 = vstv %s2570_s20  ;;  %s2664_s17 = sld [smem:[#allocation2 + $0x51]] }
  0xe7   : > { %v745_v25 = vadd.f32 %v743_v44, %v713_v63  ;;  %v762_v18 = vmul.f32 %v760_v46, %v740_v62  ;;  %v792_v51 = vstv %s2573_s21  ;;  %v2596_v5 = vmul.f32 %v1927_v22, %v798_v17  ;;  %s2669_s20 = sld [smem:[#allocation2 + $0x55]] }
  0xe8   : > { %v746_v26 = vadd.f32 %v744_v19, %v714_v47  ;;  %v751_v45 = vadd.f32 %v749_v16, %v719_v0  ;;  %v2600_v52 = vmul.f32 %v1927_v22, %v808_v4  ;;  %v828_v48 = vstv %s2577_s22  ;;  %s2672_s21 = sld [smem:[#allocation2 + $0x59]] }
  0xe9   : > { %v752_v27 = vadd.f32 %v750_v36, %v720_v10  ;;  %v2603_v53 = vmul.f32 %v1927_v22, %v818_v37  ;;  %v769_v28 = vsel %vm667_vm3, %v766_v38, %v768_v3  ;;  %v770_v1 = vsel %vm667_vm3, %v768_v3, %v766_v38  ;;  %s2674_s22 = sld [smem:[#allocation2 + $0x5d]] }
  0xea   : > { %v757_v9 = vadd.f32 %v755_v8, %v725_v15  ;;  %v758_v39 = vadd.f32 %v756_v23, %v726_v6  ;;  %v763_v29 = vadd.f32 %v761_v24, %v731_v34  ;;  %v838_v40 = vstv %s2582_s24  ;;  %s2680_s24 = sld [smem:[#allocation2 + $0x52]] }
  0xeb   : > { %v764_v30 = vadd.f32 %v762_v18, %v732_v50  ;;  %v801_v31 = vperm.slane %v2596_v5, 0  ;;  %v2611_v32 = vmul.f32 %v1927_v22, %v828_v48  ;;  %v848_v11 = vstv %s2584_s23  ;;  %v1929_v22 = vld [vmem:[%s2043_s28 + $0x2] ss:$4 sm:$0x3]  ;;  %s2693_s23 = sld [smem:[#allocation2 + $0x56]] }
  0xec   : > { %v802_v33 = vperm.slane %v2596_v5, 1  ;;  %v811_v49 = vperm.slane %v2600_v52, 0  ;;  %v771_v57 = vmul.f32 %v770_v1, %v2514_v7  ;;  %v772_v58 = vmul.f32 %v769_v28, %v2518_v60  ;;  %s2770_s18 = sld [smem:[#allocation2 + $0x6d]] }
  0xed   : > { %v812_v59 = vperm.slane %v2600_v52, 1  ;;  %v821_v2 = vperm.slane %v2603_v53, 0  ;;  %v822_v41 = vperm.slane %v2603_v53, 1  ;;  %v839_v35 = vmul.f32 %v1928_v42, %v838_v40  ;;  %s2772_s19 = sld [smem:[#allocation2 + $0x62]] }
  0xee   : > { %v858_v56 = vstv %s2592_s26  ;;  %v775_v54 = vmul.f32 %v774_v20, %v771_v57  ;;  %v776_v55 = vmul.f32 %v774_v20, %v772_v58  ;;  %v781_v62 = vmul.f32 %v780_v21, %v771_v57  ;;  %s2701_s26 = sld [smem:[#allocation2 + $0x5a]] }
  0xef   : > { %v831_v7 = vperm.slane %v2611_v32, 0  ;;  %v849_v63 = vmul.f32 %v1928_v42, %v848_v11  ;;  %v868_v60 = vstv %s2598_s27  ;;  %v782_v43 = vmul.f32 %v780_v21, %v772_v58  ;;  %v2649_v11 = vpop.permute.xlu1 %997  ;;  %s2707_s27 = sld [smem:[#allocation2 + $0x5e]] }
  0xf0   : > { %v832_v13 = vperm.slane %v2611_v32, 1  ;;  %v787_v46 = vmul.f32 %v786_v61, %v771_v57  ;;  %v788_v47 = vmul.f32 %v786_v61, %v772_v58  ;;  %v793_v0 = vmul.f32 %v792_v51, %v771_v57 }
  0xf1   : > { %v859_v10 = vmul.f32 %v1928_v42, %v858_v56  ;;  %v777_v15 = vadd.f32 %v775_v54, %v745_v25  ;;  %v778_v6 = vadd.f32 %v776_v55, %v746_v26  ;;  %v794_v34 = vmul.f32 %v792_v51, %v772_v58  ;;  %v2642_v25 = vpop.permute.xlu2 %959 }
  0xf2   : > { %v841_v50 = vperm.slane %v839_v35, 0  ;;  %v842_v44 = vperm.slane %v839_v35, 1  ;;  %v869_v19 = vmul.f32 %v1928_v42, %v868_v60  ;;  %v783_v16 = vadd.f32 %v781_v62, %v751_v45  ;;  %v1930_v62 = vld [vmem:[%s2043_s28 + $0x3] ss:$4 sm:$0x3] }
  0xf3   : > { %v851_v20 = vperm.slane %v849_v63, 0  ;;  %v852_v17 = vperm.slane %v849_v63, 1  ;;  %v784_v36 = vadd.f32 %v782_v43, %v752_v27  ;;  %v878_v21 = vstv %s2614_s29  ;;  %s2711_s29 = sld [smem:[#allocation2 + $0x53]] }
  0xf4   : > { %v789_v61 = vadd.f32 %v787_v46, %v757_v9  ;;  %v790_v4 = vadd.f32 %v788_v47, %v758_v39  ;;  %v795_v8 = vadd.f32 %v793_v0, %v763_v29  ;;  %v888_v23 = vstv %s2620_s30  ;;  %s2721_s30 = sld [smem:[#allocation2 + $0x57]] }
  0xf5   : > { %v861_v24 = vperm.slane %v859_v10, 0  ;;  %v796_v3 = vadd.f32 %v794_v34, %v764_v30  ;;  %v805_v37 = vadd.f32 %v801_v31, %v777_v15  ;;  %v806_v38 = vadd.f32 %v802_v33, %v778_v6  ;;  %v962_v31 = vpop.permute.xlu0 %961  ;;  %v1784_v34 = vld [vmem:[%s3062_s1 + $0x5] ss:$8 sm:$0x3] }
  0xf6   : > { %v862_v18 = vperm.slane %v859_v10, 1  ;;  %v815_v51 = vadd.f32 %v811_v49, %v783_v16  ;;  %v879_v5 = vmul.f32 %v1929_v22, %v878_v21  ;;  %v898_v26 = vstv %s2627_s5  ;;  %s2723_s5 = sld [smem:[#allocation2 + $0x5b]] }
  0xf7   : > { %v871_v45 = vperm.slane %v869_v19, 0  ;;  %v872_v52 = vperm.slane %v869_v19, 1  ;;  %v816_v48 = vadd.f32 %v812_v59, %v784_v36  ;;  %v889_v27 = vmul.f32 %v1929_v22, %v888_v23 }
  0xf8   : > { %v825_v53 = vadd.f32 %v821_v2, %v789_v61  ;;  %v826_v28 = vadd.f32 %v822_v41, %v790_v4  ;;  %v835_v1 = vadd.f32 %v831_v7, %v795_v8  ;;  %v908_v9 = vstv %s2632_s6  ;;  %s2725_s6 = sld [smem:[#allocation2 + $0x5f]] }
  0xf9   : > { %v836_v39 = vadd.f32 %v832_v13, %v796_v3  ;;  %v845_v29 = vadd.f32 %v841_v50, %v805_v37  ;;  %v846_v40 = vadd.f32 %v842_v44, %v806_v38  ;;  %v899_v30 = vmul.f32 %v1929_v22, %v898_v26  ;;  %v1000_v50 = vpop.permute.xlu2 %999 }
  0xfa   : > { %v855_v32 = vadd.f32 %v851_v20, %v815_v51  ;;  %v881_v33 = vperm.slane %v879_v5, 0  ;;  %v918_v49 = vstv %s2634_s7  ;;  %v928_v57 = vstv %s2636_s8  ;;  %s2737_s7 = sld [smem:[#allocation2 + $0x60]] }
  0xfb   : > { %v856_v58 = vadd.f32 %v852_v17, %v816_v48  ;;  %v882_v59 = vperm.slane %v879_v5, 1  ;;  %v891_v2 = vperm.slane %v889_v27, 0  ;;  %v892_v41 = vperm.slane %v889_v27, 1  ;;  %s2739_s8 = sld [smem:[#allocation2 + $0x64]] }
  0xfc   : > { %v865_v42 = vadd.f32 %v861_v24, %v825_v53  ;;  %v866_v35 = vadd.f32 %v862_v18, %v826_v28  ;;  %v909_v56 = vmul.f32 %v1929_v22, %v908_v9  ;;  %v938_v54 = vstv %s2640_s9  ;;  %s2741_s9 = sld [smem:[#allocation2 + $0x68]] }
  0xfd   : > { %v901_v55 = vperm.slane %v899_v30, 0  ;;  %v919_v7 = vmul.f32 %v1930_v62, %v918_v49  ;;  %v929_v63 = vmul.f32 %v1930_v62, %v928_v57  ;;  %v948_v60 = vstv %s2644_s10  ;;  %v1030_v18 = vpop.permute.xlu0 %1029  ;;  %s2844_s10 = sld [smem:[#allocation2 + $0x75]] }
  0xfe   : > { %v875_v43 = vadd.f32 %v871_v45, %v835_v1  ;;  %v876_v13 = vadd.f32 %v872_v52, %v836_v39  ;;  %v885_v46 = vadd.f32 %v881_v33, %v845_v29  ;;  %v902_v47 = vperm.slane %v899_v30, 1  ;;  %v1032_v45 = vpop.permute.xlu1 %1031 }
  0xff   : > { %v886_v0 = vadd.f32 %v882_v59, %v846_v40  ;;  %v895_v10 = vadd.f32 %v891_v2, %v855_v32  ;;  %v896_v15 = vadd.f32 %v892_v41, %v856_v58  ;;  %v939_v6 = vmul.f32 %v1930_v62, %v938_v54 }
 0x100   : > { %v911_v44 = vperm.slane %v909_v56, 0  ;;  %v912_v19 = vperm.slane %v909_v56, 1  ;;  %v949_v16 = vmul.f32 %v1930_v62, %v948_v60  ;;  %v905_v20 = vadd.f32 %v901_v55, %v865_v42 }
 0x101   : > { %v921_v17 = vperm.slane %v919_v7, 0  ;;  %v922_v36 = vperm.slane %v919_v7, 1  ;;  %v931_v21 = vperm.slane %v929_v63, 0  ;;  %v906_v61 = vadd.f32 %v902_v47, %v866_v35  ;;  %v1062_v2 = vpop.permute.xlu2 %1061 }
 0x102   : > { %v932_v4 = vperm.slane %v929_v63, 1  ;;  %v2676_v8 = vperm.slane %v1784_v34, 0  ;;  %v2678_v23 = vperm.slane %v1784_v34, 1  ;;  %v941_v24 = vperm.slane %v939_v6, 0 }
 0x103   : > { %v942_v3 = vperm.slane %v939_v6, 1  ;;  %v964_v37 = vsel %vm963_vm4, %v2642_v25, %v962_v31  ;;  %v965_v38 = vsel %vm963_vm4, %v962_v31, %v2642_v25  ;;  %v915_v51 = vadd.f32 %v911_v44, %v875_v43 }
 0x104   : > { %v916_v22 = vadd.f32 %v912_v19, %v876_v13  ;;  %v951_v5 = vperm.slane %v949_v16, 0  ;;  %v952_v26 = vperm.slane %v949_v16, 1  ;;  %v925_v52 = vadd.f32 %v921_v17, %v885_v46 }
 0x105   : > { %v926_v48 = vadd.f32 %v922_v36, %v886_v0  ;;  %v935_v27 = vadd.f32 %v931_v21, %v895_v10  ;;  %v936_v53 = vadd.f32 %v932_v4, %v896_v15  ;;  %v974_v28 = vstv %s2653_s11  ;;  %v1064_v10 = vpop.permute.xlu0 %1063  ;;  %s2848_s11 = sld [smem:[#allocation2 + $0x79]] }
 0x106   : > { %v971_v1 = vmul.f32 %v2676_v8, %v964_v37  ;;  %v972_v25 = vmul.f32 %v2678_v23, %v965_v38  ;;  %v945_v9 = vadd.f32 %v941_v24, %v905_v20  ;;  %v946_v39 = vadd.f32 %v942_v3, %v906_v61  ;;  %v2719_v44 = vpop.permute.xlu1 %1095 }
 0x107   : > { %v980_v29 = vstv %s2655_s12  ;;  %v986_v40 = vstv %s2658_s13  ;;  %v955_v30 = vadd.f32 %v951_v5, %v915_v51  ;;  %v956_v31 = vadd.f32 %v952_v26, %v916_v22  ;;  %s2750_s12 = sld [smem:[#allocation2 + $0x6c]] }
 0x108   : > { %v1001_v32 = vsel %vm963_vm4, %v2649_v11, %v1000_v50  ;;  %v1002_v33 = vsel %vm963_vm4, %v1000_v50, %v2649_v11  ;;  %v992_v49 = vstv %s2662_s14  ;;  %v1006_v57 = vstv %s2664_s17  ;;  %s2754_s13 = sld [smem:[#allocation2 + $0x61]] }
 0x109   : > { %v1012_v58 = vstv %s2669_s20  ;;  %v1018_v59 = vstv %s2672_s21  ;;  %v975_v41 = vmul.f32 %v974_v28, %v971_v1  ;;  %v976_v42 = vmul.f32 %v974_v28, %v972_v25  ;;  %s2756_s14 = sld [smem:[#allocation2 + $0x65]] }
 0x10a   : > { %v1024_v35 = vstv %s2674_s22  ;;  %v1038_v56 = vstv %s2680_s24  ;;  %v981_v54 = vmul.f32 %v980_v29, %v971_v1  ;;  %v982_v55 = vmul.f32 %v980_v29, %v972_v25  ;;  %s2762_s17 = sld [smem:[#allocation2 + $0x69]] }
 0x10b   : > { %v1003_v62 = vmul.f32 %v1001_v32, %v2676_v8  ;;  %v1004_v11 = vmul.f32 %v1002_v33, %v2678_v23  ;;  %v987_v7 = vmul.f32 %v986_v40, %v971_v1  ;;  %v988_v63 = vmul.f32 %v986_v40, %v972_v25  ;;  %s2774_s20 = sld [smem:[#allocation2 + $0x66]] }
 0x10c   : > { %v993_v60 = vmul.f32 %v992_v49, %v971_v1  ;;  %v994_v43 = vmul.f32 %v992_v49, %v972_v25  ;;  %v977_v13 = vadd.f32 %v975_v41, %v925_v52  ;;  %v978_v46 = vadd.f32 %v976_v42, %v926_v48  ;;  %s2782_s21 = sld [smem:[#allocation2 + $0x6a]] }
 0x10d   : > { %v983_v47 = vadd.f32 %v981_v54, %v935_v27  ;;  %v984_v0 = vadd.f32 %v982_v55, %v936_v53  ;;  %v989_v15 = vadd.f32 %v987_v7, %v945_v9  ;;  %v990_v6 = vadd.f32 %v988_v63, %v946_v39  ;;  %v1098_v27 = vpop.permute.xlu2 %1097  ;;  %v1134_v41 = vpop.permute.xlu0 %1133  ;;  %s2788_s22 = sld [smem:[#allocation2 + $0x6e]] }
 0x10e   : > { %v1033_v34 = vsel %vm963_vm4, %v1030_v18, %v1032_v45  ;;  %v1034_v50 = vsel %vm963_vm4, %v1032_v45, %v1030_v18  ;;  %v1007_v19 = vmul.f32 %v1006_v57, %v1003_v62  ;;  %v1008_v16 = vmul.f32 %v1006_v57, %v1004_v11  ;;  %v1136_v54 = vpop.permute.xlu1 %1135  ;;  %s2790_s24 = sld [smem:[#allocation2 + $0x63]] }
 0x10f   : > { %v1013_v20 = vmul.f32 %v1012_v58, %v1003_v62  ;;  %v1014_v17 = vmul.f32 %v1012_v58, %v1004_v11  ;;  %v995_v36 = vadd.f32 %v993_v60, %v955_v30  ;;  %v996_v21 = vadd.f32 %v994_v43, %v956_v31 }
 0x110   : > { %v1019_v61 = vmul.f32 %v1018_v59, %v1003_v62  ;;  %v1020_v4 = vmul.f32 %v1018_v59, %v1004_v11  ;;  %v1044_v24 = vstv %s2693_s23  ;;  %v1050_v3 = vstv %s2701_s26  ;;  %s2794_s23 = sld [smem:[#allocation2 + $0x67]] }
 0x111   : > { %v1035_v37 = vmul.f32 %v1033_v34, %v2676_v8  ;;  %v1036_v38 = vmul.f32 %v1034_v50, %v2678_v23  ;;  %v1025_v18 = vmul.f32 %v1024_v35, %v1003_v62  ;;  %v1026_v51 = vmul.f32 %v1024_v35, %v1004_v11  ;;  %s2806_s26 = sld [smem:[#allocation2 + $0x6b]] }
 0x112   : > { %v1056_v22 = vstv %s2707_s27  ;;  %v1070_v5 = vstv %s2711_s29  ;;  %v1009_v26 = vadd.f32 %v1007_v19, %v977_v13  ;;  %v1010_v45 = vadd.f32 %v1008_v16, %v978_v46  ;;  %s2808_s27 = sld [smem:[#allocation2 + $0x6f]] }
 0x113   : > { %v1015_v52 = vadd.f32 %v1013_v20, %v983_v47  ;;  %v1016_v48 = vadd.f32 %v1014_v17, %v984_v0  ;;  %v1021_v53 = vadd.f32 %v1019_v61, %v989_v15  ;;  %v1022_v28 = vadd.f32 %v1020_v4, %v990_v6  ;;  %s2816_s29 = sld [smem:[#allocation2 + $0x70]] }
 0x114   : > { %v1065_v1 = vsel %vm963_vm4, %v1062_v2, %v1064_v10  ;;  %v1066_v25 = vsel %vm963_vm4, %v1064_v10, %v1062_v2  ;;  %v1039_v9 = vmul.f32 %v1038_v56, %v1035_v37  ;;  %v1040_v39 = vmul.f32 %v1038_v56, %v1036_v38  ;;  %v1801_v2 = vld [vmem:[%s3062_s1 + $0x6] ss:$8 sm:$0x3] }
 0x115   : > { %v1045_v29 = vmul.f32 %v1044_v24, %v1035_v37  ;;  %v1046_v40 = vmul.f32 %v1044_v24, %v1036_v38  ;;  %v1027_v30 = vadd.f32 %v1025_v18, %v995_v36  ;;  %v1028_v31 = vadd.f32 %v1026_v51, %v996_v21  ;;  %v1166_v20 = vpop.permute.xlu2 %1165 }
 0x116   : > { %v1051_v32 = vmul.f32 %v1050_v3, %v1035_v37  ;;  %v1052_v33 = vmul.f32 %v1050_v3, %v1036_v38  ;;  %v1076_v49 = vstv %s2721_s30  ;;  %v1082_v57 = vstv %s2723_s5  ;;  %s2822_s30 = sld [smem:[#allocation2 + $0x74]] }
 0x117   : > { %v1067_v58 = vmul.f32 %v1065_v1, %v2676_v8  ;;  %v1068_v59 = vmul.f32 %v1066_v25, %v2678_v23  ;;  %v1057_v42 = vmul.f32 %v1056_v22, %v1035_v37  ;;  %v1058_v35 = vmul.f32 %v1056_v22, %v1036_v38  ;;  %v1198_v1 = vpop.permute.xlu1 %1197  ;;  %s2920_s5 = sld [smem:[#allocation2 + $0x81]] }
 0x118   : > { %v1088_v56 = vstv %s2725_s6  ;;  %v1041_v55 = vadd.f32 %v1039_v9, %v1009_v26  ;;  %v1042_v62 = vadd.f32 %v1040_v39, %v1010_v45  ;;  %v1047_v8 = vadd.f32 %v1045_v29, %v1015_v52  ;;  %v1168_v52 = vpop.permute.xlu0 %1167  ;;  %s2926_s6 = sld [smem:[#allocation2 + $0x85]] }
 0x119   : > { %v1048_v11 = vadd.f32 %v1046_v40, %v1016_v48  ;;  %v1053_v23 = vadd.f32 %v1051_v32, %v1021_v53  ;;  %v1054_v7 = vadd.f32 %v1052_v33, %v1022_v28  ;;  %v2758_v63 = vperm.slane %v1801_v2, 0 }
 0x11a   : > { %v2760_v60 = vperm.slane %v1801_v2, 1  ;;  %v1071_v43 = vmul.f32 %v1070_v5, %v1067_v58  ;;  %v1072_v13 = vmul.f32 %v1070_v5, %v1068_v59  ;;  %v1100_v46 = vsel %vm1099_vm5, %v2719_v44, %v1098_v27 }
 0x11b   : > { %v1101_v47 = vsel %vm1099_vm5, %v1098_v27, %v2719_v44  ;;  %v1077_v0 = vmul.f32 %v1076_v49, %v1067_v58  ;;  %v1078_v10 = vmul.f32 %v1076_v49, %v1068_v59  ;;  %v1083_v15 = vmul.f32 %v1082_v57, %v1067_v58 }
 0x11c   : > { %v1084_v6 = vmul.f32 %v1082_v57, %v1068_v59  ;;  %v1059_v34 = vadd.f32 %v1057_v42, %v1027_v30  ;;  %v1060_v50 = vadd.f32 %v1058_v35, %v1028_v31  ;;  %v1089_v19 = vmul.f32 %v1088_v56, %v1067_v58 }
 0x11d   : > { %v1090_v16 = vmul.f32 %v1088_v56, %v1068_v59  ;;  %v1110_v17 = vstv %s2737_s7  ;;  %v1116_v36 = vstv %s2739_s8  ;;  %v1107_v44 = vmul.f32 %v2758_v63, %v1100_v46  ;;  %s2827_s7 = sld [smem:[#allocation2 + $0x78]] }
 0x11e   : > { %v1108_v21 = vmul.f32 %v2760_v60, %v1101_v47  ;;  %v1073_v61 = vadd.f32 %v1071_v43, %v1041_v55  ;;  %v1074_v4 = vadd.f32 %v1072_v13, %v1042_v62  ;;  %v1122_v24 = vstv %s2741_s9  ;;  %v1200_v62 = vpop.permute.xlu2 %1199  ;;  %s2829_s8 = sld [smem:[#allocation2 + $0x7c]] }
 0x11f   : > { %v1128_v3 = vstv %s2750_s12  ;;  %v1079_v37 = vadd.f32 %v1077_v0, %v1047_v8  ;;  %v1080_v38 = vadd.f32 %v1078_v10, %v1048_v11  ;;  %v1085_v18 = vadd.f32 %v1083_v15, %v1053_v23  ;;  %s2838_s9 = sld [smem:[#allocation2 + $0x71]] }
 0x120   : > { %v1086_v51 = vadd.f32 %v1084_v6, %v1054_v7  ;;  %v1091_v22 = vadd.f32 %v1089_v19, %v1059_v34  ;;  %v1092_v5 = vadd.f32 %v1090_v16, %v1060_v50  ;;  %v1137_v26 = vsel %vm1099_vm5, %v1134_v41, %v1136_v54  ;;  %s2850_s12 = sld [smem:[#allocation2 + $0x7d]] }
 0x121   : > { %v1138_v45 = vsel %vm1099_vm5, %v1136_v54, %v1134_v41  ;;  %v1111_v48 = vmul.f32 %v1110_v17, %v1107_v44  ;;  %v1112_v27 = vmul.f32 %v1110_v17, %v1108_v21  ;;  %v1117_v53 = vmul.f32 %v1116_v36, %v1107_v44 }
 0x122   : > { %v1118_v28 = vmul.f32 %v1116_v36, %v1108_v21  ;;  %v1123_v25 = vmul.f32 %v1122_v24, %v1107_v44  ;;  %v1124_v9 = vmul.f32 %v1122_v24, %v1108_v21  ;;  %v1142_v39 = vstv %s2754_s13  ;;  %s2858_s13 = sld [smem:[#allocation2 + $0x72]] }
 0x123   : > { %v1148_v29 = vstv %s2756_s14  ;;  %v1154_v40 = vstv %s2762_s17  ;;  %v1160_v30 = vstv %s2770_s18  ;;  %v1139_v31 = vmul.f32 %v1137_v26, %v2758_v63  ;;  %s2862_s14 = sld [smem:[#allocation2 + $0x76]] }
 0x124   : > { %v1140_v32 = vmul.f32 %v1138_v45, %v2760_v60  ;;  %v1129_v33 = vmul.f32 %v1128_v3, %v1107_v44  ;;  %v1130_v49 = vmul.f32 %v1128_v3, %v1108_v21  ;;  %v1174_v57 = vstv %s2772_s19  ;;  %s2866_s17 = sld [smem:[#allocation2 + $0x7a]] }
 0x125   : > { %v1180_v58 = vstv %s2774_s20  ;;  %v1113_v59 = vadd.f32 %v1111_v48, %v1073_v61  ;;  %v1114_v2 = vadd.f32 %v1112_v27, %v1074_v4  ;;  %v1119_v41 = vadd.f32 %v1117_v53, %v1079_v37  ;;  %v1234_v61 = vpop.permute.xlu1 %1233  ;;  %s2868_s18 = sld [smem:[#allocation2 + $0x7e]] }
 0x126   : > { %v1120_v42 = vadd.f32 %v1118_v28, %v1080_v38  ;;  %v1125_v35 = vadd.f32 %v1123_v25, %v1085_v18  ;;  %v1126_v56 = vadd.f32 %v1124_v9, %v1086_v51  ;;  %v1169_v54 = vsel %vm1099_vm5, %v1166_v20, %v1168_v52  ;;  %s2876_s19 = sld [smem:[#allocation2 + $0x73]] }
 0x127   : > { %v1170_v55 = vsel %vm1099_vm5, %v1168_v52, %v1166_v20  ;;  %v1143_v8 = vmul.f32 %v1142_v39, %v1139_v31  ;;  %v1144_v11 = vmul.f32 %v1142_v39, %v1140_v32  ;;  %v1149_v23 = vmul.f32 %v1148_v29, %v1139_v31  ;;  %v1232_v20 = vpop.permute.xlu0 %1231  ;;  %s2878_s20 = sld [smem:[#allocation2 + $0x77]] }
 0x128   : > { %v1150_v7 = vmul.f32 %v1148_v29, %v1140_v32  ;;  %v1131_v43 = vadd.f32 %v1129_v33, %v1091_v22  ;;  %v1132_v13 = vadd.f32 %v1130_v49, %v1092_v5  ;;  %v1155_v46 = vmul.f32 %v1154_v40, %v1139_v31  ;;  %v1818_v5 = vld [vmem:[%s3062_s1 + $0x7] ss:$8 sm:$0x3]  ;;  %v1270_v29 = vpop.permute.xlu2 %1269 }
 0x129   : > { %v1156_v47 = vmul.f32 %v1154_v40, %v1140_v32  ;;  %v1186_v0 = vstv %s2782_s21  ;;  %v1192_v10 = vstv %s2788_s22  ;;  %v1171_v15 = vmul.f32 %v1169_v54, %v2758_v63  ;;  %s2882_s21 = sld [smem:[#allocation2 + $0x7b]] }
 0x12a   : > { %v1172_v6 = vmul.f32 %v1170_v55, %v2760_v60  ;;  %v1161_v34 = vmul.f32 %v1160_v30, %v1139_v31  ;;  %v1162_v50 = vmul.f32 %v1160_v30, %v1140_v32  ;;  %v1206_v19 = vstv %s2790_s24  ;;  %s2884_s22 = sld [smem:[#allocation2 + $0x7f]] }
 0x12b   : > { %v1212_v16 = vstv %s2794_s23  ;;  %v1145_v17 = vadd.f32 %v1143_v8, %v1113_v59  ;;  %v1146_v36 = vadd.f32 %v1144_v11, %v1114_v2  ;;  %v1151_v44 = vadd.f32 %v1149_v23, %v1119_v41  ;;  %s2899_s24 = sld [smem:[#allocation2 + $0x80]] }
 0x12c   : > { %v1152_v21 = vadd.f32 %v1150_v7, %v1120_v42  ;;  %v1157_v4 = vadd.f32 %v1155_v46, %v1125_v35  ;;  %v1158_v24 = vadd.f32 %v1156_v47, %v1126_v56  ;;  %v1201_v3 = vsel %vm1099_vm5, %v1198_v1, %v1200_v62  ;;  %s2998_s23 = sld [smem:[#allocation4 + $0x5]] }
 0x12d   : > { %v1202_v37 = vsel %vm1099_vm5, %v1200_v62, %v1198_v1  ;;  %v1175_v38 = vmul.f32 %v1174_v57, %v1171_v15  ;;  %v1176_v18 = vmul.f32 %v1174_v57, %v1172_v6  ;;  %v1181_v51 = vmul.f32 %v1180_v58, %v1171_v15  ;;  %v1302_v23 = vpop.permute.xlu1 %1301 }
 0x12e   : > { %v1182_v22 = vmul.f32 %v1180_v58, %v1172_v6  ;;  %v1163_v26 = vadd.f32 %v1161_v34, %v1131_v43  ;;  %v1164_v45 = vadd.f32 %v1162_v50, %v1132_v13  ;;  %v1187_v52 = vmul.f32 %v1186_v0, %v1171_v15 }
 0x12f   : > { %v1188_v48 = vmul.f32 %v1186_v0, %v1172_v6  ;;  %v1218_v27 = vstv %s2806_s26  ;;  %v1203_v53 = vmul.f32 %v1201_v3, %v2758_v63  ;;  %v1204_v28 = vmul.f32 %v1202_v37, %v2760_v60  ;;  %v1272_v54 = vpop.permute.xlu0 %1271  ;;  %s3000_s26 = sld [smem:[#allocation4 + $0x6]] }
 0x130   : > { %v1193_v1 = vmul.f32 %v1192_v10, %v1171_v15  ;;  %v1194_v25 = vmul.f32 %v1192_v10, %v1172_v6  ;;  %v1224_v9 = vstv %s2808_s27  ;;  %v2836_v39 = vperm.slane %v1818_v5, 0  ;;  %s2908_s27 = sld [smem:[#allocation2 + $0x84]] }
 0x131   : > { %v1177_v40 = vadd.f32 %v1175_v38, %v1145_v17  ;;  %v1178_v30 = vadd.f32 %v1176_v18, %v1146_v36  ;;  %v1183_v31 = vadd.f32 %v1181_v51, %v1151_v44  ;;  %v1184_v32 = vadd.f32 %v1182_v22, %v1152_v21 }
 0x132   : > { %v1189_v33 = vadd.f32 %v1187_v52, %v1157_v4  ;;  %v1190_v49 = vadd.f32 %v1188_v48, %v1158_v24  ;;  %v2840_v63 = vperm.slane %v1818_v5, 1  ;;  %v1236_v60 = vsel %vm1235_vm6, %v1232_v20, %v1234_v61  ;;  %v1304_v24 = vpop.permute.xlu2 %1303 }
 0x133   : > { %v1207_v57 = vmul.f32 %v1206_v19, %v1203_v53  ;;  %v1208_v58 = vmul.f32 %v1206_v19, %v1204_v28  ;;  %v1213_v59 = vmul.f32 %v1212_v16, %v1203_v53  ;;  %v1237_v2 = vsel %vm1235_vm6, %v1234_v61, %v1232_v20 }
 0x134   : > { %v1195_v41 = vadd.f32 %v1193_v1, %v1163_v26  ;;  %v1214_v42 = vmul.f32 %v1212_v16, %v1204_v28  ;;  %v1219_v35 = vmul.f32 %v1218_v27, %v1203_v53  ;;  %v1220_v56 = vmul.f32 %v1218_v27, %v1204_v28 }
 0x135   : > { %v1196_v55 = vadd.f32 %v1194_v25, %v1164_v45  ;;  %v1246_v62 = vstv %s2816_s29  ;;  %v1252_v8 = vstv %s2822_s30  ;;  %v1243_v11 = vmul.f32 %v2836_v39, %v1236_v60  ;;  %s2912_s29 = sld [smem:[#allocation2 + $0x88]] }
 0x136   : > { %v1225_v7 = vmul.f32 %v1224_v9, %v1203_v53  ;;  %v1258_v43 = vstv %s2827_s7  ;;  %v1264_v13 = vstv %s2829_s8  ;;  %v1244_v46 = vmul.f32 %v2840_v63, %v1237_v2  ;;  %s2914_s30 = sld [smem:[#allocation2 + $0x8c]] }
 0x137   : > { %v1209_v47 = vadd.f32 %v1207_v57, %v1177_v40  ;;  %v1210_v0 = vadd.f32 %v1208_v58, %v1178_v30  ;;  %v1215_v10 = vadd.f32 %v1213_v59, %v1183_v31  ;;  %v1226_v15 = vmul.f32 %v1224_v9, %v1204_v28  ;;  %v1334_v9 = vpop.permute.xlu0 %1333  ;;  %s2928_s7 = sld [smem:[#allocation2 + $0x89]] }
 0x138   : > { %v1216_v6 = vadd.f32 %v1214_v42, %v1184_v32  ;;  %v1221_v34 = vadd.f32 %v1219_v35, %v1189_v33  ;;  %v1222_v50 = vadd.f32 %v1220_v56, %v1190_v49  ;;  %v1273_v19 = vsel %vm1235_vm6, %v1270_v29, %v1272_v54  ;;  %v1336_v32 = vpop.permute.xlu1 %1335  ;;  %s2930_s8 = sld [smem:[#allocation2 + $0x8d]] }
 0x139   : > { %v1247_v16 = vmul.f32 %v1246_v62, %v1243_v11  ;;  %v1253_v20 = vmul.f32 %v1252_v8, %v1243_v11  ;;  %v1259_v17 = vmul.f32 %v1258_v43, %v1243_v11  ;;  %v1274_v36 = vsel %vm1235_vm6, %v1272_v54, %v1270_v29 }
 0x13a   : > { %v1227_v44 = vadd.f32 %v1225_v7, %v1195_v41  ;;  %v1248_v21 = vmul.f32 %v1246_v62, %v1244_v46  ;;  %v1254_v61 = vmul.f32 %v1252_v8, %v1244_v46  ;;  %v1265_v4 = vmul.f32 %v1264_v13, %v1243_v11 }
 0x13b   : > { %v1278_v3 = vstv %s2838_s9  ;;  %v1284_v37 = vstv %s2844_s10  ;;  %v1290_v38 = vstv %s2848_s11  ;;  %v1275_v18 = vmul.f32 %v1273_v19, %v2836_v39  ;;  %s2937_s9 = sld [smem:[#allocation2 + $0x82]] }
 0x13c   : > { %v1260_v51 = vmul.f32 %v1258_v43, %v1244_v46  ;;  %v1266_v22 = vmul.f32 %v1264_v13, %v1244_v46  ;;  %v1296_v5 = vstv %s2850_s12  ;;  %v1276_v26 = vmul.f32 %v1274_v36, %v2840_v63  ;;  %v1368_v46 = vpop.permute.xlu2 %1367  ;;  %s2943_s10 = sld [smem:[#allocation2 + $0x86]] }
 0x13d   : > { %v1228_v45 = vadd.f32 %v1226_v15, %v1196_v55  ;;  %v1249_v52 = vadd.f32 %v1247_v16, %v1209_v47  ;;  %v1255_v48 = vadd.f32 %v1253_v20, %v1215_v10  ;;  %v1261_v27 = vadd.f32 %v1259_v17, %v1221_v34  ;;  %s2946_s11 = sld [smem:[#allocation2 + $0x8a]] }
 0x13e   : > { %v1250_v53 = vadd.f32 %v1248_v21, %v1210_v0  ;;  %v1256_v28 = vadd.f32 %v1254_v61, %v1216_v6  ;;  %v1267_v1 = vadd.f32 %v1265_v4, %v1227_v44  ;;  %v1305_v25 = vsel %vm1235_vm6, %v1302_v23, %v1304_v24  ;;  %v1835_v44 = vld [vmem:[%s3062_s1 + $0x10] ss:$8 sm:$0x3]  ;;  %s2948_s12 = sld [smem:[#allocation2 + $0x8e]] }
 0x13f   : > { %v1279_v29 = vmul.f32 %v1278_v3, %v1275_v18  ;;  %v1285_v40 = vmul.f32 %v1284_v37, %v1275_v18  ;;  %v1291_v30 = vmul.f32 %v1290_v38, %v1275_v18  ;;  %v1297_v31 = vmul.f32 %v1296_v5, %v1275_v18 }
 0x140   : > { %v1262_v33 = vadd.f32 %v1260_v51, %v1222_v50  ;;  %v1268_v49 = vadd.f32 %v1266_v22, %v1228_v45  ;;  %v1280_v60 = vmul.f32 %v1278_v3, %v1276_v26  ;;  %v1286_v57 = vmul.f32 %v1284_v37, %v1276_v26 }
 0x141   : > { %v1292_v58 = vmul.f32 %v1290_v38, %v1276_v26  ;;  %v1310_v59 = vstv %s2858_s13  ;;  %v1306_v2 = vsel %vm1235_vm6, %v1304_v24, %v1302_v23  ;;  %v1307_v41 = vmul.f32 %v1305_v25, %v2836_v39  ;;  %v1370_v24 = vpop.permute.xlu0 %1369  ;;  %s2956_s13 = sld [smem:[#allocation2 + $0x83]] }
 0x142   : > { %v1298_v42 = vmul.f32 %v1296_v5, %v1276_v26  ;;  %v1316_v35 = vstv %s2862_s14  ;;  %v1322_v56 = vstv %s2866_s17  ;;  %v1328_v54 = vstv %s2868_s18  ;;  %s2962_s14 = sld [smem:[#allocation2 + $0x87]] }
 0x143   : > { %v1281_v55 = vadd.f32 %v1279_v29, %v1249_v52  ;;  %v1287_v62 = vadd.f32 %v1285_v40, %v1255_v48  ;;  %v1293_v8 = vadd.f32 %v1291_v30, %v1261_v27  ;;  %v1299_v11 = vadd.f32 %v1297_v31, %v1267_v1  ;;  %s2964_s17 = sld [smem:[#allocation2 + $0x8b]] }
 0x144   : > { %v1282_v7 = vadd.f32 %v1280_v60, %v1250_v53  ;;  %v1288_v43 = vadd.f32 %v1286_v57, %v1256_v28  ;;  %v1308_v13 = vmul.f32 %v1306_v2, %v2840_v63  ;;  %v1337_v23 = vsel %vm1235_vm6, %v1334_v9, %v1336_v32  ;;  %s2966_s18 = sld [smem:[#allocation2 + $0x8f]] }
 0x145   : > { %v1294_v47 = vadd.f32 %v1292_v58, %v1262_v33  ;;  %v1311_v0 = vmul.f32 %v1310_v59, %v1307_v41  ;;  %v1317_v10 = vmul.f32 %v1316_v35, %v1307_v41  ;;  %v1338_v15 = vsel %vm1235_vm6, %v1336_v32, %v1334_v9 }
 0x146   : > { %v1300_v6 = vadd.f32 %v1298_v42, %v1268_v49  ;;  %v1323_v34 = vmul.f32 %v1322_v56, %v1307_v41  ;;  %v1329_v50 = vmul.f32 %v1328_v54, %v1307_v41  ;;  %v1342_v19 = vstv %s2876_s19  ;;  %v1408_v49 = vpop.permute.xlu2 %1407  ;;  %s2970_s19 = sld [smem:[#allocation4]] }
 0x147   : > { %v1348_v16 = vstv %s2878_s20  ;;  %v1354_v20 = vstv %s2882_s21  ;;  %v1360_v17 = vstv %s2884_s22  ;;  %v1339_v36 = vmul.f32 %v1337_v23, %v2836_v39  ;;  %v1406_v39 = vpop.permute.xlu1 %1405  ;;  %s2974_s20 = sld [smem:[#allocation4 + $0x1]] }
 0x148   : > { %v1312_v21 = vmul.f32 %v1310_v59, %v1308_v13  ;;  %v1318_v61 = vmul.f32 %v1316_v35, %v1308_v13  ;;  %v1340_v4 = vmul.f32 %v1338_v15, %v2840_v63  ;;  %v1313_v3 = vadd.f32 %v1311_v0, %v1281_v55  ;;  %s2978_s21 = sld [smem:[#allocation4 + $0x2]] }
 0x149   : > { %v1319_v37 = vadd.f32 %v1317_v10, %v1287_v62  ;;  %v1324_v38 = vmul.f32 %v1322_v56, %v1308_v13  ;;  %v1330_v18 = vmul.f32 %v1328_v54, %v1308_v13  ;;  %v1325_v51 = vadd.f32 %v1323_v34, %v1293_v8  ;;  %v1438_v10 = vpop.permute.xlu0 %1437  ;;  %s2980_s22 = sld [smem:[#allocation4 + $0x3]] }
 0x14a   : > { %v1331_v22 = vadd.f32 %v1329_v50, %v1299_v11  ;;  %v2916_v5 = vperm.slane %v1835_v44, 0  ;;  %v2918_v26 = vperm.slane %v1835_v44, 1  ;;  %v1343_v63 = vmul.f32 %v1342_v19, %v1339_v36 }
 0x14b   : > { %v1349_v45 = vmul.f32 %v1348_v16, %v1339_v36  ;;  %v1372_v52 = vsel %vm1371_vm7, %v1368_v46, %v1370_v24  ;;  %v1373_v48 = vsel %vm1371_vm7, %v1370_v24, %v1368_v46  ;;  %v1314_v27 = vadd.f32 %v1312_v21, %v1282_v7 }
 0x14c   : > { %v1344_v53 = vmul.f32 %v1342_v19, %v1340_v4  ;;  %v1355_v28 = vmul.f32 %v1354_v20, %v1339_v36  ;;  %v1361_v1 = vmul.f32 %v1360_v17, %v1339_v36  ;;  %v1320_v25 = vadd.f32 %v1318_v61, %v1288_v43 }
 0x14d   : > { %v1326_v9 = vadd.f32 %v1324_v38, %v1294_v47  ;;  %v1350_v29 = vmul.f32 %v1348_v16, %v1340_v4  ;;  %v1356_v40 = vmul.f32 %v1354_v20, %v1340_v4  ;;  %v1332_v30 = vadd.f32 %v1330_v18, %v1300_v6 }
 0x14e   : > { %v1362_v31 = vmul.f32 %v1360_v17, %v1340_v4  ;;  %v1379_v32 = vmul.f32 %v2916_v5, %v1372_v52  ;;  %v1380_v33 = vmul.f32 %v2918_v26, %v1373_v48  ;;  %v1345_v60 = vadd.f32 %v1343_v63, %v1313_v3 }
 0x14f   : > { %v1351_v57 = vadd.f32 %v1349_v45, %v1319_v37  ;;  %v1382_v58 = vstv %s2899_s24  ;;  %v1388_v59 = vstv %s2908_s27  ;;  %v1346_v2 = vadd.f32 %v1344_v53, %v1314_v27  ;;  %v1440_v0 = vpop.permute.xlu1 %1439  ;;  %s2996_s24 = sld [smem:[#allocation4 + $0x4]] }
 0x150   : > { %v1357_v41 = vadd.f32 %v1355_v28, %v1325_v51  ;;  %v1363_v42 = vadd.f32 %v1361_v1, %v1331_v22  ;;  %v1394_v35 = vstv %s2912_s29  ;;  %v1352_v56 = vadd.f32 %v1350_v29, %v1320_v25  ;;  %s3002_s27 = sld [smem:[#allocation4 + $0x8]] }
 0x151   : > { %v1358_v54 = vadd.f32 %v1356_v40, %v1326_v9  ;;  %v1409_v55 = vsel %vm1371_vm7, %v1406_v39, %v1408_v49  ;;  %v1410_v62 = vsel %vm1371_vm7, %v1408_v49, %v1406_v39  ;;  %v1364_v8 = vadd.f32 %v1362_v31, %v1332_v30  ;;  %s3004_s29 = sld [smem:[#allocation4 + $0x7]] }
 0x152   : > { %v1400_v11 = vstv %s2914_s30  ;;  %v1383_v7 = vmul.f32 %v1382_v58, %v1379_v32  ;;  %v1384_v43 = vmul.f32 %v1382_v58, %v1380_v33  ;;  %v1389_v13 = vmul.f32 %v1388_v59, %v1379_v32  ;;  %s3006_s30 = sld [smem:[#allocation4 + $0xc]] }
 0x153   : > { %v1390_v23 = vmul.f32 %v1388_v59, %v1380_v33  ;;  %v1395_v46 = vmul.f32 %v1394_v35, %v1379_v32  ;;  %v1396_v47 = vmul.f32 %v1394_v35, %v1380_v33  ;;  %v1414_v15 = vstv %s2920_s5  ;;  %s3009_s5 = sld [smem:[#allocation4 + $0x9]] }
 0x154   : > { %v1420_v6 = vstv %s2926_s6  ;;  %v1411_v34 = vmul.f32 %v1409_v55, %v2916_v5  ;;  %v1412_v50 = vmul.f32 %v1410_v62, %v2918_v26  ;;  %v1401_v19 = vmul.f32 %v1400_v11, %v1379_v32  ;;  %v1472_v62 = vpop.permute.xlu0 %1471  ;;  %s3012_s6 = sld [smem:[#allocation4 + $0xd]] }
 0x155   : > { %v1402_v16 = vmul.f32 %v1400_v11, %v1380_v33  ;;  %v1426_v20 = vstv %s2928_s7  ;;  %v1432_v17 = vstv %s2930_s8  ;;  %v1385_v36 = vadd.f32 %v1383_v7, %v1345_v60  ;;  %s3014_s7 = sld [smem:[#allocation4 + $0xa]] }
 0x156   : > { %v1386_v44 = vadd.f32 %v1384_v43, %v1346_v2  ;;  %v1441_v21 = vsel %vm1371_vm7, %v1438_v10, %v1440_v0  ;;  %v1442_v61 = vsel %vm1371_vm7, %v1440_v0, %v1438_v10  ;;  %v1391_v4 = vadd.f32 %v1389_v13, %v1351_v57  ;;  %s3017_s8 = sld [smem:[#allocation4 + $0xe]] }
 0x157   : > { %v1392_v24 = vadd.f32 %v1390_v23, %v1352_v56  ;;  %v1397_v3 = vadd.f32 %v1395_v46, %v1357_v41  ;;  %v1398_v37 = vadd.f32 %v1396_v47, %v1358_v54  ;;  %v1415_v38 = vmul.f32 %v1414_v15, %v1411_v34  ;;  %v1470_v54 = vpop.permute.xlu2 %1469 }
 0x158   : > { %v1416_v18 = vmul.f32 %v1414_v15, %v1412_v50  ;;  %v1421_v39 = vmul.f32 %v1420_v6, %v1411_v34  ;;  %v1422_v51 = vmul.f32 %v1420_v6, %v1412_v50  ;;  %v1403_v22 = vadd.f32 %v1401_v19, %v1363_v42 }
 0x159   : > { %v1427_v63 = vmul.f32 %v1426_v20, %v1411_v34  ;;  %v1443_v45 = vmul.f32 %v1441_v21, %v2916_v5  ;;  %v1444_v52 = vmul.f32 %v1442_v61, %v2918_v26  ;;  %v1428_v48 = vmul.f32 %v1426_v20, %v1412_v50 }
 0x15a   : > { %v1433_v27 = vmul.f32 %v1432_v17, %v1411_v34  ;;  %v1446_v53 = vstv %s2937_s9  ;;  %v1452_v28 = vstv %s2943_s10  ;;  %v1404_v1 = vadd.f32 %v1402_v16, %v1364_v8  ;;  %s3019_s9 = sld [smem:[#allocation4 + $0xb]] }
 0x15b   : > { %v1434_v25 = vmul.f32 %v1432_v17, %v1412_v50  ;;  %v1458_v9 = vstv %s2946_s11  ;;  %v1464_v29 = vstv %s2948_s12  ;;  %v1417_v40 = vadd.f32 %v1415_v38, %v1385_v36  ;;  %s3023_s10 = sld [smem:[#allocation4 + $0xf]] }
 0x15c   : > { %v1418_v30 = vadd.f32 %v1416_v18, %v1386_v44  ;;  %v1423_v31 = vadd.f32 %v1421_v39, %v1391_v4  ;;  %v1424_v32 = vadd.f32 %v1422_v51, %v1392_v24  ;;  %v1429_v33 = vadd.f32 %v1427_v63, %v1397_v3 }
 0x15d   : > { %v1447_v49 = vmul.f32 %v1446_v53, %v1443_v45  ;;  %v1448_v60 = vmul.f32 %v1446_v53, %v1444_v52  ;;  %v1453_v57 = vmul.f32 %v1452_v28, %v1443_v45  ;;  %v1430_v58 = vadd.f32 %v1428_v48, %v1398_v37 }
 0x15e   : > { %v1435_v59 = vadd.f32 %v1433_v27, %v1403_v22  ;;  %v1454_v2 = vmul.f32 %v1452_v28, %v1444_v52  ;;  %v1459_v41 = vmul.f32 %v1458_v9, %v1443_v45  ;;  %v1436_v42 = vadd.f32 %v1434_v25, %v1404_v1 }
 0x15f   : > { %v1460_v35 = vmul.f32 %v1458_v9, %v1444_v52  ;;  %v1465_v56 = vmul.f32 %v1464_v29, %v1443_v45  ;;  %v1478_v55 = vstv %s2956_s13  ;;  %v1466_v8 = vmul.f32 %v1464_v29, %v1444_v52  ;;  %s224_s13 = scalar_lea.vmem %s3065_s4, %s1872_s25 }
 0x160   : > { %v1484_v11 = vstv %s2962_s14  ;;  %v1490_v7 = vstv %s2964_s17  ;;  %v1496_v43 = vstv %s2966_s18  ;;  %v1449_v13 = vadd.f32 %v1447_v49, %v1417_v40 }
 0x161   : > { %v1450_v23 = vadd.f32 %v1448_v60, %v1418_v30  ;;  %v1455_v46 = vadd.f32 %v1453_v57, %v1423_v31  ;;  %v1502_v47 = vstv %s2970_s19  ;;  %v1456_v0 = vadd.f32 %v1454_v2, %v1424_v32 }
 0x162   : > { %v1461_v10 = vadd.f32 %v1459_v41, %v1429_v33  ;;  %v1473_v15 = vsel %vm1371_vm7, %v1470_v54, %v1472_v62  ;;  %v1474_v6 = vsel %vm1371_vm7, %v1472_v62, %v1470_v54  ;;  %v1462_v34 = vadd.f32 %v1460_v35, %v1430_v58 }
 0x163   : > { %v1467_v50 = vadd.f32 %v1465_v56, %v1435_v59  ;;  %v1475_v19 = vmul.f32 %v1473_v15, %v2916_v5  ;;  %v1476_v16 = vmul.f32 %v1474_v6, %v2918_v26  ;;  %v1468_v20 = vadd.f32 %v1466_v8, %v1436_v42 }
 0x164   : > { %v1532_v17 = vstv %s2974_s20  ;;  %v1558_v36 = vstv %s2978_s21  ;;  %v1584_v44 = vstv %s2980_s22  ;;  %v1510_v57 = vstv %s2996_s24 }
 0x165   : > { %v1479_v21 = vmul.f32 %v1478_v55, %v1475_v19  ;;  %v1480_v61 = vmul.f32 %v1478_v55, %v1476_v16  ;;  %v1485_v4 = vmul.f32 %v1484_v11, %v1475_v19  ;;  %v1486_v24 = vmul.f32 %v1484_v11, %v1476_v16 }
 0x166   : > { %v1491_v3 = vmul.f32 %v1490_v7, %v1475_v19  ;;  %v1492_v37 = vmul.f32 %v1490_v7, %v1476_v16  ;;  %v1497_v38 = vmul.f32 %v1496_v43, %v1475_v19  ;;  %v1498_v18 = vmul.f32 %v1496_v43, %v1476_v16 }
 0x167   : > { %v1481_v14 = vadd.f32 %v1479_v21, %v1449_v13  ;;  %v1482_v39 = vadd.f32 %v1480_v61, %v1450_v23  ;;  %v1487_v51 = vadd.f32 %v1485_v4, %v1455_v46  ;;  %v1488_v22 = vadd.f32 %v1486_v24, %v1456_v0  ;;  %v1932_v61 = vld [vmem:[%s2043_s28 + $0x1] ss:$4 sm:$0x3] }
 0x168   : > { %v1493_v63 = vadd.f32 %v1491_v3, %v1461_v10  ;;  %v1494_v5 = vadd.f32 %v1492_v37, %v1462_v34  ;;  %v1499_v45 = vadd.f32 %v1497_v38, %v1467_v50  ;;  %v1500_v26 = vadd.f32 %v1498_v18, %v1468_v20  ;;  %v1931_v34 = vld [vmem:[%s2043_s28] ss:$4 sm:$0x3] }
 0x169   : > { %v1503_v52 = vadd.f32 %v1502_v47, %v1481_v14  ;;  %v1504_v48 = vadd.f32 %v1502_v47, %v1482_v39  ;;  %v1533_v27 = vadd.f32 %v1532_v17, %v1487_v51  ;;  %v1534_v53 = vadd.f32 %v1532_v17, %v1488_v22  ;;  %v1933_v14 = vld [vmem:[%s2043_s28 + $0x2] ss:$4 sm:$0x3] }
 0x16a   : > { %v1559_v28 = vadd.f32 %v1558_v36, %v1493_v63  ;;  %v1560_v1 = vadd.f32 %v1558_v36, %v1494_v5  ;;  %v1585_v40 = vadd.f32 %v1584_v44, %v1499_v45  ;;  %v1586_v31 = vadd.f32 %v1584_v44, %v1500_v26  ;;  %v1934_v26 = vld [vmem:[%s2043_s28 + $0x3] ss:$4 sm:$0x3] }
 0x16b   : > { %v1506_v25 = vmul.f32 0.5, %v1503_v52  ;;  %v1507_v9 = vmul.f32 0.5, %v1504_v48  ;;  %v1536_v29 = vmul.f32 0.5, %v1533_v27  ;;  %v1537_v30 = vmul.f32 0.5, %v1534_v53 }
 0x16c   : > { %v1562_v32 = vmul.f32 0.5, %v1559_v28  ;;  %v1563_v33 = vmul.f32 0.5, %v1560_v1  ;;  %v1588_v49 = vmul.f32 0.5, %v1585_v40  ;;  %v1589_v60 = vmul.f32 0.5, %v1586_v31 }
 0x16d   : > { %1911 = vtanh.f32 %v1506_v25  ;;  %v1540_v2 = vstv %s2998_s23  ;;  %v1566_v56 = vstv %s3000_s26  ;;  %v1522_v7 = vstv %s3002_s27 }
 0x16e   : > { %1913 = vtanh.f32 %v1507_v9  ;;  %v1592_v43 = vstv %s3004_s29  ;;  %v1524_v15 = vstv %s3006_s30  ;;  %v1551_v6 = vstv %s3009_s5 }
 0x16f   : > { %1915 = vtanh.f32 %v1536_v29  ;;  %v1553_v44 = vstv %s3012_s6  ;;  %v1577_v24 = vstv %s3014_s7  ;;  %v1579_v51 = vstv %s3017_s8 }
 0x170   : > { %1917 = vtanh.f32 %v1537_v30  ;;  %v1603_v22 = vstv %s3019_s9  ;;  %v1605_v48 = vstv %s3023_s10 }
 0x171   : > { %1919 = vtanh.f32 %v1562_v32 }
 0x172   : > { %1921 = vtanh.f32 %v1563_v33 }
 0x173   : > { %v1912_v58 = vpop.eup %1911  ;;  %1923 = vtanh.f32 %v1588_v49 }
 0x174   : > { %v1914_v59 = vpop.eup %1913  ;;  %1925 = vtanh.f32 %v1589_v60  ;;  %v1511_v55 = vmul.f32 %v1912_v58, %v1510_v57 }
 0x175   : > { %v1916_v41 = vpop.eup %1915  ;;  %v1512_v42 = vmul.f32 %v1914_v59, %v1510_v57 }
 0x176   : > { %v1918_v35 = vpop.eup %1917  ;;  %v1541_v46 = vmul.f32 %v1916_v41, %v1540_v2 }
 0x177   : > { %v1920_v54 = vpop.eup %1919  ;;  %v1515_v62 = vrot.slane %v1512_v42, 7  ;;  %v1542_v8 = vmul.f32 %v1918_v35, %v1540_v2 }
 0x178   : > { %v1922_v11 = vpop.eup %1921  ;;  %v1567_v16 = vmul.f32 %v1920_v54, %v1566_v56 }
 0x179   : > { %v1924_v13 = vpop.eup %1923  ;;  %v1517_v23 = vsel %vm1516_vm8, %v1511_v55, %v1515_v62  ;;  %v1545_v47 = vrot.slane %v1542_v8, 7  ;;  %v1568_v0 = vmul.f32 %v1922_v11, %v1566_v56 }
 0x17a   : > { %v1926_v10 = vpop.eup %1925  ;;  %v1519_v50 = vadd.f32 %v1931_v34, %v1517_v23  ;;  %v1593_v37 = vmul.f32 %v1924_v13, %v1592_v43 }
 0x17b   : > { %v1546_v19 = vsel %vm1516_vm8, %v1541_v46, %v1545_v47  ;;  %v1571_v20 = vrot.slane %v1568_v0, 7  ;;  %v1594_v17 = vmul.f32 %v1926_v10, %v1592_v43 }
 0x17c   : > { %v1523_v21 = vmax.f32 %v1522_v7, %v1519_v50  ;;  %v1548_v4 = vadd.f32 %v1932_v61, %v1546_v19 }
 0x17d   : > { %v1572_v3 = vsel %vm1516_vm8, %v1567_v16, %v1571_v20  ;;  %v1597_v38 = vrot.slane %v1594_v17, 7 }
 0x17e   : > { %v1525_v12 = vmin.f32 %v1524_v15, %v1523_v21  ;;  %v1552_v18 = vmax.f32 %v1551_v6, %v1548_v4  ;;  %v1574_v39 = vadd.f32 %v1933_v14, %v1572_v3 }
 0x17f   : > { %v1598_v63 = vsel %vm1516_vm8, %v1593_v37, %v1597_v38 }
 0x180   : > { %1530 = vst.msk [vmem:[%s224_s13] ss:$4 sm:$0x3] %vm3031_vm9, %v1525_v12  ;;  %v1554_v5 = vmin.f32 %v1553_v44, %v1552_v18  ;;  %v1578_v45 = vmax.f32 %v1577_v24, %v1574_v39  ;;  %v1600_v52 = vadd.f32 %v1934_v26, %v1598_v63 }
 0x182   : > { %1859 = vst.msk [vmem:[%s224_s13 + $0x1] ss:$4 sm:$0x3] %vm3031_vm9, %v1554_v5  ;;  %v1580_v27 = vmin.f32 %v1579_v51, %v1578_v45  ;;  %v1604_v53 = vmax.f32 %v1603_v22, %v1600_v52 }
 0x184   : > { %1864 = vst.msk [vmem:[%s224_s13 + $0x2] ss:$4 sm:$0x3] %vm3031_vm9, %v1580_v27  ;;  %v1606_v28 = vmin.f32 %v1605_v48, %v1604_v53 }
 0x186   : > { %1869 = vst.msk [vmem:[%s224_s13 + $0x3] ss:$4 sm:$0x3] %vm3031_vm9, %v1606_v28 }
 0x187 PF: > { %s16_s15 = sadd.s32 1, %s1979_s15  }
 0x188   : > { %p13_p7 = scmp.ge.s32.totalorder %s16_s15, 4  }
 0x18a   :  { %15 = sbr.rel (!%p13_p7) target bundleno = 2 (0x2), region = 88 }
 0x18f   :  { %1630 = vsyncpa [#allocation3], 1 }
 0x190   :  { %1632 = vsyncpa [#allocation3 + $0x1], 1 }
 0x191   :  { %1633 = vsyncpa [#allocation5], 1 }

</bundles_post_ra>
